<compile_context>
chip_gen: v6e
topology: v6e:2x2x1
jax: 0.10.0
libtpu: 0.0.40
codegen_flags: <defaults>
</compile_context>

<pallas_src>
import functools

import jax
import jax.numpy as jnp
from jax.experimental import pallas as pl
from jax.experimental.pallas import tpu as pltpu

_EPS = 1e-5


def _wide_resblock_kernel(x_ref, ln_g_ref, ln_b_ref,
                          bn1_g_ref, bn1_b_ref, w1_ref,
                          bn2_g_ref, bn2_b_ref, w2_ref,
                          o_ref, pad_ref, *, N, H, W, C, Co):
    """Activations lane-dense (N*H, W*Ch); f32 elementwise, bf16 MXU operands."""
    WC = W * C

    # ---------------- LayerNorm over per-sample (C, H, W) ----------------
    x3 = x_ref[...].reshape(N, H, WC)                               # (N, H, W*C) f32
    inv_hwc = 1.0 / float(H * WC)
    mu = jnp.sum(jnp.sum(x3, axis=2, keepdims=True),
                 axis=1, keepdims=True) * inv_hwc                   # (N, 1, 1)
    xc = x3 - mu
    var = jnp.sum(jnp.sum(xc * xc, axis=2, keepdims=True),
                  axis=1, keepdims=True) * inv_hwc
    inv = jax.lax.rsqrt(var + _EPS)
    x_ln = (xc * inv * ln_g_ref[...][None] + ln_b_ref[...][None]).reshape(N * H, WC)
    o_ref[...] = x_ln          # save residual now; kernel finishes with o_ref += h

    # ---------------- helpers ----------------
    def lane_fold(v, ch):
        # Circular log2(W) roll+add tree along lanes: folds the W channel-groups
        # of a (1, W*ch) row into per-channel totals, already tiled back across
        # lanes (no lane->sublane reshape, no re-broadcast).  Requires W = 2^k.
        s = v
        shift = ch
        while shift < W * ch:
            s = s + pltpu.roll(s, shift=shift, axis=1)
            shift *= 2
        return s

    def bn_relu(h, gamma_t, beta_t, ch):
        # Training-mode BatchNorm2d (biased batch stats over N,H,W) + ReLU.
        # h: (N*H, W*ch) f32; gamma_t / beta_t: (1, W*ch) channel-tiled.
        inv_cnt = 1.0 / float(N * H * W)
        mean_t = lane_fold(jnp.sum(h, axis=0, keepdims=True), ch) * inv_cnt
        d = h - mean_t
        var_t = lane_fold(jnp.sum(d * d, axis=0, keepdims=True), ch) * inv_cnt
        scale_t = gamma_t * jax.lax.rsqrt(var_t + _EPS)
        # Cast to bf16 here: the result is only ever a conv (MXU) operand.
        return jnp.maximum(d * scale_t + beta_t, 0.0).astype(jnp.bfloat16)

    def conv3x3(h_bf16, w_ref, ci, co):
        # 3x3 'same' cross-correlation, stride 1, no bias, as 3 full-tile
        # matmuls against block-banded (W*ci, W*co) weights.  The MXU result is
        # already the lane-dense (N*H, W*co) slab.
        pad_ref[:, 1:H + 1, :] = h_bf16.reshape(N, H, W * ci)       # interior rows
        out = None
        for ky in range(3):
            if ky == 1:
                rows = h_bf16                                       # centre tap: no shift
            else:
                rows = pad_ref[:, ky:ky + H, :].reshape(N * H, W * ci)
            part = jnp.dot(rows, w_ref[ky], preferred_element_type=jnp.float32)
            out = part if out is None else out + part
        return out                                                  # (N*H, W*co) f32

    # Zero ONLY the halo rows (2 per image); the interior is overwritten by
    # each conv's store and the halo is shared by both convs.
    zero_row = jnp.zeros((N, 1, WC), jnp.bfloat16)
    pad_ref[:, 0:1, :] = zero_row
    pad_ref[:, H + 1:H + 2, :] = zero_row

    # ---------------- residual branch ----------------
    h = bn_relu(x_ln, bn1_g_ref[...], bn1_b_ref[...], C)            # relu(bn1(ln(x)))
    h = conv3x3(h, w1_ref, C, Co)                                   # conv1
    h = bn_relu(h, bn2_g_ref[...], bn2_b_ref[...], Co)              # relu(bn2(.))
    h = conv3x3(h, w2_ref, Co, Co)                                  # conv2
    # dropout p=0.0 -> no-op

    # ---------------- identity shortcut add (dense store) ----------------
    o_ref[...] = o_ref[...] + h


def _banded_weights(w_oihw, Wd):
    """PyTorch OIHW 3x3 conv weight -> (3, Wd*Ci, Wd*Co) bf16 block-banded mats.

    B[ky, x_in*Ci + ci, x_out*Co + co] = w[ky, kx, ci, co] with kx = x_in - x_out + 1
    when 0 <= kx <= 2, else 0 — so image rows taken at (y + ky - 1) matmul'd
    against B[ky] yield the 'same'-padded conv output row, already lane-dense.
    """
    w = jnp.transpose(w_oihw, (2, 3, 1, 0)).astype(jnp.float32)     # (3,3,Ci,Co)
    _, _, Ci, Co = w.shape
    kx = jnp.arange(Wd)[:, None] - jnp.arange(Wd)[None, :] + 1      # (x_in, x_out)
    valid = (kx >= 0) & (kx <= 2)
    kx_c = jnp.clip(kx, 0, 2)
    mats = []
    for ky in range(3):
        blocks = jnp.where(valid[..., None, None], w[ky][kx_c], 0.0)  # (W,W,Ci,Co)
        mats.append(jnp.transpose(blocks, (0, 2, 1, 3)).reshape(Wd * Ci, Wd * Co))
    return jnp.stack(mats, axis=0).astype(jnp.bfloat16)


def wide_resblock_forward(x_nchw, params):
    """x_nchw: (N, C, H, W) float32; params use PyTorch-convention shapes."""
    x = jnp.transpose(x_nchw, (0, 2, 3, 1)).astype(jnp.float32)     # NCHW -> NHWC
    N, H, W, C = x.shape
    Co = params["conv1_weight"].shape[0]
    assert Co == C, "equalInOut path only (convShortcut not implemented)"
    assert W & (W - 1) == 0, "lane-fold tree assumes power-of-two W"

    # Lane-dense view: row = (n, h), lane = (w, c); W*C = 256 here.
    x2d = x.reshape(N * H, W * C)

    # LN affine: (C,H,W) -> (H, W*C); broadcast over N happens in-kernel.
    ln_g = jnp.transpose(params["ln_weight"], (1, 2, 0)).reshape(H, W * C).astype(jnp.float32)
    ln_b = jnp.transpose(params["ln_bias"], (1, 2, 0)).reshape(H, W * C).astype(jnp.float32)

    # BN affine pre-tiled to the lane-dense view: (1, W*C), lane = w*C + c.
    bn1_g = jnp.tile(params["bn1_weight"].astype(jnp.float32), W).reshape(1, W * C)
    bn1_b = jnp.tile(params["bn1_bias"].astype(jnp.float32), W).reshape(1, W * C)
    bn2_g = jnp.tile(params["bn2_weight"].astype(jnp.float32), W).reshape(1, W * Co)
    bn2_b = jnp.tile(params["bn2_bias"].astype(jnp.float32), W).reshape(1, W * Co)

    # Block-banded conv weights, one (W*Ci, W*Co) matrix per ky; bf16 MXU operands.
    w1b = _banded_weights(params["conv1_weight"], W)                 # (3, W*C,  W*Co)
    w2b = _banded_weights(params["conv2_weight"], W)                 # (3, W*Co, W*Co)

    kernel = functools.partial(_wide_resblock_kernel, N=N, H=H, W=W, C=C, Co=Co)
    vmem = pl.BlockSpec(memory_space=pltpu.MemorySpace.VMEM)
    out2d = pl.pallas_call(
        kernel,
        out_shape=jax.ShapeDtypeStruct((N * H, W * Co), jnp.float32),
        in_specs=[vmem] * 9,
        out_specs=vmem,
        scratch_shapes=[pltpu.VMEM((N, H + 2, W * C), jnp.bfloat16)],  # padded slab
    )(x2d, ln_g, ln_b, bn1_g, bn1_b, w1b, bn2_g, bn2_b, w2b)

    return jnp.transpose(out2d.reshape(N, H, W, Co), (0, 3, 1, 2))   # NHWC -> NCHW


if __name__ == "__main__":
    # WideResBlock(shape=(C,H,W), in_c=C, out_c=C) at small shapes.
    N, C, H, W = 2, 16, 16, 16
    key = jax.random.PRNGKey(0)
    ks = jax.random.split(key, 8)
    x = jax.random.normal(ks[0], (N, C, H, W), jnp.float32)
    params = {
        "ln_weight": 1.0 + 0.1 * jax.random.normal(ks[1], (C, H, W), jnp.float32),
        "ln_bias": 0.1 * jax.random.normal(ks[2], (C, H, W), jnp.float32),
        "bn1_weight": 1.0 + 0.1 * jax.random.normal(ks[3], (C,), jnp.float32),
        "bn1_bias": 0.1 * jax.random.normal(ks[4], (C,), jnp.float32),
        "conv1_weight": 0.1 * jax.random.normal(ks[5], (C, C, 3, 3), jnp.float32),
        "bn2_weight": 1.0 + 0.1 * jax.random.normal(ks[6], (C,), jnp.float32),
        "bn2_bias": jnp.zeros((C,), jnp.float32),
        "conv2_weight": 0.1 * jax.random.normal(ks[7], (C, C, 3, 3), jnp.float32),
    }

    out = jax.block_until_ready(wide_resblock_forward(x, params))

    # Pure-JAX f32 reference in NCHW, matching the PyTorch forward semantics.
    def _ref(x, p):
        mu = jnp.mean(x, axis=(1, 2, 3), keepdims=True)
        var = jnp.mean((x - mu) ** 2, axis=(1, 2, 3), keepdims=True)
        xl = (x - mu) / jnp.sqrt(var + _EPS) * p["ln_weight"][None] + p["ln_bias"][None]

        def bn_relu(h, g, b):
            m = jnp.mean(h, axis=(0, 2, 3), keepdims=True)
            v = jnp.mean((h - m) ** 2, axis=(0, 2, 3), keepdims=True)
            return jax.nn.relu((h - m) / jnp.sqrt(v + _EPS)
                               * g[None, :, None, None] + b[None, :, None, None])

        def conv(h, w):
            return jax.lax.conv_general_dilated(
                h, w, (1, 1), ((1, 1), (1, 1)),
                dimension_numbers=("NCHW", "OIHW", "NCHW"))

        h = bn_relu(xl, p["bn1_weight"], p["bn1_bias"])
        h = conv(h, p["conv1_weight"])
        h = bn_relu(h, p["bn2_weight"], p["bn2_bias"])
        h = conv(h, p["conv2_weight"])
        return xl + h

    ref = _ref(x, params)
    assert out.shape == (N, C, H, W)
    err = float(jnp.max(jnp.abs(out - ref)))
    # Tolerance reflects the deliberate bf16 MXU operands (f32 accumulation).
    assert jnp.allclose(out, ref, rtol=5e-2, atol=5e-2), f"max abs err {err}"
    print("KERNEL_OK")
</pallas_src>

<mosaic_0001>
module attributes {stable_mosaic.version = 11 : i64} {
  func.func @_wide_resblock_kernel(%arg0: memref<32x256xf32, #tpu.memory_space<vmem>>, %arg1: memref<16x256xf32, #tpu.memory_space<vmem>>, %arg2: memref<16x256xf32, #tpu.memory_space<vmem>>, %arg3: memref<1x256xf32, #tpu.memory_space<vmem>>, %arg4: memref<1x256xf32, #tpu.memory_space<vmem>>, %arg5: memref<3x256x256xbf16, #tpu.memory_space<vmem>>, %arg6: memref<1x256xf32, #tpu.memory_space<vmem>>, %arg7: memref<1x256xf32, #tpu.memory_space<vmem>>, %arg8: memref<3x256x256xbf16, #tpu.memory_space<vmem>>, %arg9: memref<32x256xf32, #tpu.memory_space<vmem>>, %arg10: memref<2x18x256xbf16, #tpu.memory_space<vmem>>) attributes {dimension_semantics = [], scalar_prefetch = 0 : i64, scratch_operands = 1 : i64, tpu.core_type = #tpu.core_type<tc>} {
    %c0 = arith.constant 0 : index
    %c0_0 = arith.constant 0 : index
    %0 = vector.load %arg0[%c0, %c0_0] : memref<32x256xf32, #tpu.memory_space<vmem>>, vector<32x256xf32>
    %1 = vector.shape_cast %0 : vector<32x256xf32> to vector<2x16x256xf32>
    %cst = arith.constant dense<0.000000e+00> : vector<2x16xf32>
    %2 = vector.multi_reduction <add>, %1, %cst [2] : vector<2x16x256xf32> to vector<2x16xf32>
    %3 = vector.shape_cast %2 : vector<2x16xf32> to vector<2x16x1xf32>
    %cst_1 = arith.constant dense<0.000000e+00> : vector<2x1xf32>
    %4 = vector.multi_reduction <add>, %3, %cst_1 [1] : vector<2x16x1xf32> to vector<2x1xf32>
    %5 = vector.shape_cast %4 : vector<2x1xf32> to vector<2x1x1xf32>
    %cst_2 = arith.constant 2.44140625E-4 : f32
    %6 = vector.broadcast %cst_2 : f32 to vector<2x1x1xf32>
    %7 = arith.mulf %5, %6 : vector<2x1x1xf32>
    %8 = vector.broadcast %7 : vector<2x1x1xf32> to vector<2x16x256xf32>
    %9 = arith.subf %1, %8 : vector<2x16x256xf32>
    %10 = arith.mulf %9, %9 : vector<2x16x256xf32>
    %cst_3 = arith.constant dense<0.000000e+00> : vector<2x16xf32>
    %11 = vector.multi_reduction <add>, %10, %cst_3 [2] : vector<2x16x256xf32> to vector<2x16xf32>
    %12 = vector.shape_cast %11 : vector<2x16xf32> to vector<2x16x1xf32>
    %cst_4 = arith.constant dense<0.000000e+00> : vector<2x1xf32>
    %13 = vector.multi_reduction <add>, %12, %cst_4 [1] : vector<2x16x1xf32> to vector<2x1xf32>
    %14 = vector.shape_cast %13 : vector<2x1xf32> to vector<2x1x1xf32>
    %cst_5 = arith.constant 2.44140625E-4 : f32
    %15 = vector.broadcast %cst_5 : f32 to vector<2x1x1xf32>
    %16 = arith.mulf %14, %15 : vector<2x1x1xf32>
    %cst_6 = arith.constant 9.99999974E-6 : f32
    %17 = vector.broadcast %cst_6 : f32 to vector<2x1x1xf32>
    %18 = arith.addf %16, %17 : vector<2x1x1xf32>
    %19 = math.rsqrt %18 : vector<2x1x1xf32>
    %20 = vector.broadcast %19 : vector<2x1x1xf32> to vector<2x16x256xf32>
    %21 = arith.mulf %9, %20 : vector<2x16x256xf32>
    %c0_7 = arith.constant 0 : index
    %c0_8 = arith.constant 0 : index
    %22 = vector.load %arg1[%c0_7, %c0_8] : memref<16x256xf32, #tpu.memory_space<vmem>>, vector<16x256xf32>
    %23 = vector.shape_cast %22 : vector<16x256xf32> to vector<1x16x256xf32>
    %24 = vector.broadcast %23 : vector<1x16x256xf32> to vector<2x16x256xf32>
    %25 = arith.mulf %21, %24 : vector<2x16x256xf32>
    %c0_9 = arith.constant 0 : index
    %c0_10 = arith.constant 0 : index
    %26 = vector.load %arg2[%c0_9, %c0_10] : memref<16x256xf32, #tpu.memory_space<vmem>>, vector<16x256xf32>
    %27 = vector.shape_cast %26 : vector<16x256xf32> to vector<1x16x256xf32>
    %28 = vector.broadcast %27 : vector<1x16x256xf32> to vector<2x16x256xf32>
    %29 = arith.addf %25, %28 : vector<2x16x256xf32>
    %30 = vector.shape_cast %29 : vector<2x16x256xf32> to vector<32x256xf32>
    %c0_11 = arith.constant 0 : index
    %c0_12 = arith.constant 0 : index
    %31 = vector.load %arg9[%c0_11, %c0_12] : memref<32x256xf32, #tpu.memory_space<vmem>>, vector<32x256xf32>
    tpu.vector_store %arg9[%c0_11, %c0_12], %30 {strides = array<i32>} : memref<32x256xf32, #tpu.memory_space<vmem>>, vector<32x256xf32>,
    %cst_13 = arith.constant 0.000000e+00 : bf16
    %32 = vector.broadcast %cst_13 : bf16 to vector<2x1x256xbf16>
    %c0_14 = arith.constant 0 : index
    %c0_15 = arith.constant 0 : index
    %c0_16 = arith.constant 0 : index
    %33 = vector.load %arg10[%c0_14, %c0_15, %c0_16] : memref<2x18x256xbf16, #tpu.memory_space<vmem>>, vector<2x1x256xbf16>
    tpu.vector_store %arg10[%c0_14, %c0_15, %c0_16], %32 {strides = array<i32>} : memref<2x18x256xbf16, #tpu.memory_space<vmem>>, vector<2x1x256xbf16>,
    %c0_17 = arith.constant 0 : index
    %c17 = arith.constant 17 : index
    %c0_18 = arith.constant 0 : index
    %34 = vector.load %arg10[%c0_17, %c17, %c0_18] : memref<2x18x256xbf16, #tpu.memory_space<vmem>>, vector<2x1x256xbf16>
    tpu.vector_store %arg10[%c0_17, %c17, %c0_18], %32 {strides = array<i32>} : memref<2x18x256xbf16, #tpu.memory_space<vmem>>, vector<2x1x256xbf16>,
    %c0_19 = arith.constant 0 : index
    %c0_20 = arith.constant 0 : index
    %35 = vector.load %arg3[%c0_19, %c0_20] : memref<1x256xf32, #tpu.memory_space<vmem>>, vector<1x256xf32>
    %c0_21 = arith.constant 0 : index
    %c0_22 = arith.constant 0 : index
    %36 = vector.load %arg4[%c0_21, %c0_22] : memref<1x256xf32, #tpu.memory_space<vmem>>, vector<1x256xf32>
    %cst_23 = arith.constant dense<0.000000e+00> : vector<256xf32>
    %37 = vector.multi_reduction <add>, %30, %cst_23 [0] : vector<32x256xf32> to vector<256xf32>
    %38 = vector.shape_cast %37 : vector<256xf32> to vector<1x256xf32>
    %c16_i32 = arith.constant 16 : i32
    %39 = tpu.dynamic_rotate %38 by %c16_i32 dim 1 : vector<1x256xf32>, i32 -> vector<1x256xf32>
    %40 = arith.addf %38, %39 : vector<1x256xf32>
    %c32_i32 = arith.constant 32 : i32
    %41 = tpu.dynamic_rotate %40 by %c32_i32 dim 1 : vector<1x256xf32>, i32 -> vector<1x256xf32>
    %42 = arith.addf %40, %41 : vector<1x256xf32>
    %c64_i32 = arith.constant 64 : i32
    %43 = tpu.dynamic_rotate %42 by %c64_i32 dim 1 : vector<1x256xf32>, i32 -> vector<1x256xf32>
    %44 = arith.addf %42, %43 : vector<1x256xf32>
    %c128_i32 = arith.constant 128 : i32
    %45 = tpu.dynamic_rotate %44 by %c128_i32 dim 1 : vector<1x256xf32>, i32 -> vector<1x256xf32>
    %46 = arith.addf %44, %45 : vector<1x256xf32>
    %cst_24 = arith.constant 0.001953125 : f32
    %47 = vector.broadcast %cst_24 : f32 to vector<1x256xf32>
    %48 = arith.mulf %46, %47 : vector<1x256xf32>
    %49 = vector.broadcast %48 : vector<1x256xf32> to vector<32x256xf32>
    %50 = arith.subf %30, %49 : vector<32x256xf32>
    %51 = arith.mulf %50, %50 : vector<32x256xf32>
    %cst_25 = arith.constant dense<0.000000e+00> : vector<256xf32>
    %52 = vector.multi_reduction <add>, %51, %cst_25 [0] : vector<32x256xf32> to vector<256xf32>
    %53 = vector.shape_cast %52 : vector<256xf32> to vector<1x256xf32>
    %c16_i32_26 = arith.constant 16 : i32
    %54 = tpu.dynamic_rotate %53 by %c16_i32_26 dim 1 : vector<1x256xf32>, i32 -> vector<1x256xf32>
    %55 = arith.addf %53, %54 : vector<1x256xf32>
    %c32_i32_27 = arith.constant 32 : i32
    %56 = tpu.dynamic_rotate %55 by %c32_i32_27 dim 1 : vector<1x256xf32>, i32 -> vector<1x256xf32>
    %57 = arith.addf %55, %56 : vector<1x256xf32>
    %c64_i32_28 = arith.constant 64 : i32
    %58 = tpu.dynamic_rotate %57 by %c64_i32_28 dim 1 : vector<1x256xf32>, i32 -> vector<1x256xf32>
    %59 = arith.addf %57, %58 : vector<1x256xf32>
    %c128_i32_29 = arith.constant 128 : i32
    %60 = tpu.dynamic_rotate %59 by %c128_i32_29 dim 1 : vector<1x256xf32>, i32 -> vector<1x256xf32>
    %61 = arith.addf %59, %60 : vector<1x256xf32>
    %cst_30 = arith.constant 0.001953125 : f32
    %62 = vector.broadcast %cst_30 : f32 to vector<1x256xf32>
    %63 = arith.mulf %61, %62 : vector<1x256xf32>
    %cst_31 = arith.constant 9.99999974E-6 : f32
    %64 = vector.broadcast %cst_31 : f32 to vector<1x256xf32>
    %65 = arith.addf %63, %64 : vector<1x256xf32>
    %66 = math.rsqrt %65 : vector<1x256xf32>
    %67 = arith.mulf %35, %66 : vector<1x256xf32>
    %68 = vector.broadcast %67 : vector<1x256xf32> to vector<32x256xf32>
    %69 = arith.mulf %50, %68 : vector<32x256xf32>
    %70 = vector.broadcast %36 : vector<1x256xf32> to vector<32x256xf32>
    %71 = arith.addf %69, %70 : vector<32x256xf32>
    %cst_32 = arith.constant 0.000000e+00 : f32
    %72 = vector.broadcast %cst_32 : f32 to vector<32x256xf32>
    %73 = arith.maximumf %71, %72 : vector<32x256xf32>
    %74 = arith.truncf %73 : vector<32x256xf32> to vector<32x256xbf16>
    %75 = vector.shape_cast %74 : vector<32x256xbf16> to vector<2x16x256xbf16>
    %c0_33 = arith.constant 0 : index
    %c1 = arith.constant 1 : index
    %c0_34 = arith.constant 0 : index
    %76 = vector.load %arg10[%c0_33, %c1, %c0_34] : memref<2x18x256xbf16, #tpu.memory_space<vmem>>, vector<2x16x256xbf16>
    tpu.vector_store %arg10[%c0_33, %c1, %c0_34], %75 {strides = array<i32>} : memref<2x18x256xbf16, #tpu.memory_space<vmem>>, vector<2x16x256xbf16>,
    %c0_35 = arith.constant 0 : index
    %c0_36 = arith.constant 0 : index
    %c0_37 = arith.constant 0 : index
    %77 = vector.load %arg10[%c0_35, %c0_36, %c0_37] : memref<2x18x256xbf16, #tpu.memory_space<vmem>>, vector<2x16x256xbf16>
    %78 = vector.shape_cast %77 : vector<2x16x256xbf16> to vector<32x256xbf16>
    %c0_38 = arith.constant 0 : index
    %c0_39 = arith.constant 0 : index
    %c0_40 = arith.constant 0 : index
    %79 = vector.load %arg5[%c0_38, %c0_39, %c0_40] : memref<3x256x256xbf16, #tpu.memory_space<vmem>>, vector<1x256x256xbf16>
    %80 = vector.shape_cast %79 : vector<1x256x256xbf16> to vector<256x256xbf16>
    %cst_41 = arith.constant dense<0.000000e+00> : vector<32x256xf32>
    %81 = tpu.matmul %78, %80, %cst_41 {dimension_numbers = #tpu.dot_dimension_numbers<[1], [0], [0], [1], [0, 0, 1, 1], [], []>} : vector<32x256xbf16>, vector<256x256xbf16>, vector<32x256xf32> -> vector<32x256xf32>
    %c1_42 = arith.constant 1 : index
    %c0_43 = arith.constant 0 : index
    %c0_44 = arith.constant 0 : index
    %82 = vector.load %arg5[%c1_42, %c0_43, %c0_44] : memref<3x256x256xbf16, #tpu.memory_space<vmem>>, vector<1x256x256xbf16>
    %83 = vector.shape_cast %82 : vector<1x256x256xbf16> to vector<256x256xbf16>
    %cst_45 = arith.constant dense<0.000000e+00> : vector<32x256xf32>
    %84 = tpu.matmul %74, %83, %cst_45 {dimension_numbers = #tpu.dot_dimension_numbers<[1], [0], [0], [1], [0, 0, 1, 1], [], []>} : vector<32x256xbf16>, vector<256x256xbf16>, vector<32x256xf32> -> vector<32x256xf32>
    %85 = arith.addf %81, %84 : vector<32x256xf32>
    %c0_46 = arith.constant 0 : index
    %c2 = arith.constant 2 : index
    %c0_47 = arith.constant 0 : index
    %86 = vector.load %arg10[%c0_46, %c2, %c0_47] : memref<2x18x256xbf16, #tpu.memory_space<vmem>>, vector<2x16x256xbf16>
    %87 = vector.shape_cast %86 : vector<2x16x256xbf16> to vector<32x256xbf16>
    %c2_48 = arith.constant 2 : index
    %c0_49 = arith.constant 0 : index
    %c0_50 = arith.constant 0 : index
    %88 = vector.load %arg5[%c2_48, %c0_49, %c0_50] : memref<3x256x256xbf16, #tpu.memory_space<vmem>>, vector<1x256x256xbf16>
    %89 = vector.shape_cast %88 : vector<1x256x256xbf16> to vector<256x256xbf16>
    %cst_51 = arith.constant dense<0.000000e+00> : vector<32x256xf32>
    %90 = tpu.matmul %87, %89, %cst_51 {dimension_numbers = #tpu.dot_dimension_numbers<[1], [0], [0], [1], [0, 0, 1, 1], [], []>} : vector<32x256xbf16>, vector<256x256xbf16>, vector<32x256xf32> -> vector<32x256xf32>
    %91 = arith.addf %85, %90 : vector<32x256xf32>
    %c0_52 = arith.constant 0 : index
    %c0_53 = arith.constant 0 : index
    %92 = vector.load %arg6[%c0_52, %c0_53] : memref<1x256xf32, #tpu.memory_space<vmem>>, vector<1x256xf32>
    %c0_54 = arith.constant 0 : index
    %c0_55 = arith.constant 0 : index
    %93 = vector.load %arg7[%c0_54, %c0_55] : memref<1x256xf32, #tpu.memory_space<vmem>>, vector<1x256xf32>
    %cst_56 = arith.constant dense<0.000000e+00> : vector<256xf32>
    %94 = vector.multi_reduction <add>, %91, %cst_56 [0] : vector<32x256xf32> to vector<256xf32>
    %95 = vector.shape_cast %94 : vector<256xf32> to vector<1x256xf32>
    %c16_i32_57 = arith.constant 16 : i32
    %96 = tpu.dynamic_rotate %95 by %c16_i32_57 dim 1 : vector<1x256xf32>, i32 -> vector<1x256xf32>
    %97 = arith.addf %95, %96 : vector<1x256xf32>
    %c32_i32_58 = arith.constant 32 : i32
    %98 = tpu.dynamic_rotate %97 by %c32_i32_58 dim 1 : vector<1x256xf32>, i32 -> vector<1x256xf32>
    %99 = arith.addf %97, %98 : vector<1x256xf32>
    %c64_i32_59 = arith.constant 64 : i32
    %100 = tpu.dynamic_rotate %99 by %c64_i32_59 dim 1 : vector<1x256xf32>, i32 -> vector<1x256xf32>
    %101 = arith.addf %99, %100 : vector<1x256xf32>
    %c128_i32_60 = arith.constant 128 : i32
    %102 = tpu.dynamic_rotate %101 by %c128_i32_60 dim 1 : vector<1x256xf32>, i32 -> vector<1x256xf32>
    %103 = arith.addf %101, %102 : vector<1x256xf32>
    %cst_61 = arith.constant 0.001953125 : f32
    %104 = vector.broadcast %cst_61 : f32 to vector<1x256xf32>
    %105 = arith.mulf %103, %104 : vector<1x256xf32>
    %106 = vector.broadcast %105 : vector<1x256xf32> to vector<32x256xf32>
    %107 = arith.subf %91, %106 : vector<32x256xf32>
    %108 = arith.mulf %107, %107 : vector<32x256xf32>
    %cst_62 = arith.constant dense<0.000000e+00> : vector<256xf32>
    %109 = vector.multi_reduction <add>, %108, %cst_62 [0] : vector<32x256xf32> to vector<256xf32>
    %110 = vector.shape_cast %109 : vector<256xf32> to vector<1x256xf32>
    %c16_i32_63 = arith.constant 16 : i32
    %111 = tpu.dynamic_rotate %110 by %c16_i32_63 dim 1 : vector<1x256xf32>, i32 -> vector<1x256xf32>
    %112 = arith.addf %110, %111 : vector<1x256xf32>
    %c32_i32_64 = arith.constant 32 : i32
    %113 = tpu.dynamic_rotate %112 by %c32_i32_64 dim 1 : vector<1x256xf32>, i32 -> vector<1x256xf32>
    %114 = arith.addf %112, %113 : vector<1x256xf32>
    %c64_i32_65 = arith.constant 64 : i32
    %115 = tpu.dynamic_rotate %114 by %c64_i32_65 dim 1 : vector<1x256xf32>, i32 -> vector<1x256xf32>
    %116 = arith.addf %114, %115 : vector<1x256xf32>
    %c128_i32_66 = arith.constant 128 : i32
    %117 = tpu.dynamic_rotate %116 by %c128_i32_66 dim 1 : vector<1x256xf32>, i32 -> vector<1x256xf32>
    %118 = arith.addf %116, %117 : vector<1x256xf32>
    %cst_67 = arith.constant 0.001953125 : f32
    %119 = vector.broadcast %cst_67 : f32 to vector<1x256xf32>
    %120 = arith.mulf %118, %119 : vector<1x256xf32>
    %cst_68 = arith.constant 9.99999974E-6 : f32
    %121 = vector.broadcast %cst_68 : f32 to vector<1x256xf32>
    %122 = arith.addf %120, %121 : vector<1x256xf32>
    %123 = math.rsqrt %122 : vector<1x256xf32>
    %124 = arith.mulf %92, %123 : vector<1x256xf32>
    %125 = vector.broadcast %124 : vector<1x256xf32> to vector<32x256xf32>
    %126 = arith.mulf %107, %125 : vector<32x256xf32>
    %127 = vector.broadcast %93 : vector<1x256xf32> to vector<32x256xf32>
    %128 = arith.addf %126, %127 : vector<32x256xf32>
    %cst_69 = arith.constant 0.000000e+00 : f32
    %129 = vector.broadcast %cst_69 : f32 to vector<32x256xf32>
    %130 = arith.maximumf %128, %129 : vector<32x256xf32>
    %131 = arith.truncf %130 : vector<32x256xf32> to vector<32x256xbf16>
    %132 = vector.shape_cast %131 : vector<32x256xbf16> to vector<2x16x256xbf16>
    %c0_70 = arith.constant 0 : index
    %c1_71 = arith.constant 1 : index
    %c0_72 = arith.constant 0 : index
    %133 = vector.load %arg10[%c0_70, %c1_71, %c0_72] : memref<2x18x256xbf16, #tpu.memory_space<vmem>>, vector<2x16x256xbf16>
    tpu.vector_store %arg10[%c0_70, %c1_71, %c0_72], %132 {strides = array<i32>} : memref<2x18x256xbf16, #tpu.memory_space<vmem>>, vector<2x16x256xbf16>,
    %c0_73 = arith.constant 0 : index
    %c0_74 = arith.constant 0 : index
    %c0_75 = arith.constant 0 : index
    %134 = vector.load %arg10[%c0_73, %c0_74, %c0_75] : memref<2x18x256xbf16, #tpu.memory_space<vmem>>, vector<2x16x256xbf16>
    %135 = vector.shape_cast %134 : vector<2x16x256xbf16> to vector<32x256xbf16>
    %c0_76 = arith.constant 0 : index
    %c0_77 = arith.constant 0 : index
    %c0_78 = arith.constant 0 : index
    %136 = vector.load %arg8[%c0_76, %c0_77, %c0_78] : memref<3x256x256xbf16, #tpu.memory_space<vmem>>, vector<1x256x256xbf16>
    %137 = vector.shape_cast %136 : vector<1x256x256xbf16> to vector<256x256xbf16>
    %cst_79 = arith.constant dense<0.000000e+00> : vector<32x256xf32>
    %138 = tpu.matmul %135, %137, %cst_79 {dimension_numbers = #tpu.dot_dimension_numbers<[1], [0], [0], [1], [0, 0, 1, 1], [], []>} : vector<32x256xbf16>, vector<256x256xbf16>, vector<32x256xf32> -> vector<32x256xf32>
    %c1_80 = arith.constant 1 : index
    %c0_81 = arith.constant 0 : index
    %c0_82 = arith.constant 0 : index
    %139 = vector.load %arg8[%c1_80, %c0_81, %c0_82] : memref<3x256x256xbf16, #tpu.memory_space<vmem>>, vector<1x256x256xbf16>
    %140 = vector.shape_cast %139 : vector<1x256x256xbf16> to vector<256x256xbf16>
    %cst_83 = arith.constant dense<0.000000e+00> : vector<32x256xf32>
    %141 = tpu.matmul %131, %140, %cst_83 {dimension_numbers = #tpu.dot_dimension_numbers<[1], [0], [0], [1], [0, 0, 1, 1], [], []>} : vector<32x256xbf16>, vector<256x256xbf16>, vector<32x256xf32> -> vector<32x256xf32>
    %142 = arith.addf %138, %141 : vector<32x256xf32>
    %c0_84 = arith.constant 0 : index
    %c2_85 = arith.constant 2 : index
    %c0_86 = arith.constant 0 : index
    %143 = vector.load %arg10[%c0_84, %c2_85, %c0_86] : memref<2x18x256xbf16, #tpu.memory_space<vmem>>, vector<2x16x256xbf16>
    %144 = vector.shape_cast %143 : vector<2x16x256xbf16> to vector<32x256xbf16>
    %c2_87 = arith.constant 2 : index
    %c0_88 = arith.constant 0 : index
    %c0_89 = arith.constant 0 : index
    %145 = vector.load %arg8[%c2_87, %c0_88, %c0_89] : memref<3x256x256xbf16, #tpu.memory_space<vmem>>, vector<1x256x256xbf16>
    %146 = vector.shape_cast %145 : vector<1x256x256xbf16> to vector<256x256xbf16>
    %cst_90 = arith.constant dense<0.000000e+00> : vector<32x256xf32>
    %147 = tpu.matmul %144, %146, %cst_90 {dimension_numbers = #tpu.dot_dimension_numbers<[1], [0], [0], [1], [0, 0, 1, 1], [], []>} : vector<32x256xbf16>, vector<256x256xbf16>, vector<32x256xf32> -> vector<32x256xf32>
    %148 = arith.addf %142, %147 : vector<32x256xf32>
    %c0_91 = arith.constant 0 : index
    %c0_92 = arith.constant 0 : index
    %149 = vector.load %arg9[%c0_91, %c0_92] : memref<32x256xf32, #tpu.memory_space<vmem>>, vector<32x256xf32>
    %150 = arith.addf %149, %148 : vector<32x256xf32>
    %c0_93 = arith.constant 0 : index
    %c0_94 = arith.constant 0 : index
    %151 = vector.load %arg9[%c0_93, %c0_94] : memref<32x256xf32, #tpu.memory_space<vmem>>, vector<32x256xf32>
    tpu.vector_store %arg9[%c0_93, %c0_94], %150 {strides = array<i32>} : memref<32x256xf32, #tpu.memory_space<vmem>>, vector<32x256xf32>,
    return
  }
}

</mosaic_0001>

<bundles_post_ra>
// kernel: tpu_custom_call.1
= control target key start
LH: loop header
LB: loop body
LE: loop exit
PB: predicated region body
PF: predicated region fallthrough
CT: control target
= control target key end

     0   :  { %14 = vsyncpa [#allocation4], 0  ;;  %s3549_s0 = inlined_call_operand.hbm [shape: f32[32,256], index: 0, kind: input, shape index: {}]   ;;  %s3550_s1 = inlined_call_operand.hbm [shape: f32[16,256], index: 1, kind: input, shape index: {}]   ;;  %s3551_s2 = inlined_call_operand.hbm [shape: f32[16,256], index: 2, kind: input, shape index: {}]   ;;  %s3552_s3 = inlined_call_operand.vmem [shape: f32[1,256], index: 3, kind: input, shape index: {}]   ;;  %s3553_s4 = inlined_call_operand.vmem [shape: f32[1,256], index: 4, kind: input, shape index: {}]   ;;  %s3554_s5 = inlined_call_operand.hbm [shape: bf16[3,256,256], index: 5, kind: input, shape index: {}]   ;;  %s3555_s6 = inlined_call_operand.vmem [shape: f32[1,256], index: 6, kind: input, shape index: {}]   ;;  %s3556_s7 = inlined_call_operand.vmem [shape: f32[1,256], index: 7, kind: input, shape index: {}]   ;;  %s3557_s8 = inlined_call_operand.hbm [shape: bf16[3,256,256], index: 8, kind: input, shape index: {}]   ;;  %s3558_s9 = inlined_call_operand.hbm [shape: f32[32,256], index: 9, kind: output, shape index: {}]  }
   0x1   :  { %15 = vsyncpa [#allocation7], 0 }
   0x2   :  { %16 = vsyncpa [#allocation10], 0 }
   0x3   :  { %17 = vsyncpa [#allocation5], 0  ;;  %s3095_s30 = smov [#allocation6]   ;;  %s3096_s11 = smov [#allocation9]  }
   0x4   :  { %s35_s10 = sshll.u32 %s3095_s30, 4  ;;  %s63_s12 = sshll.u32 %s3096_s11, 4  ;;  %s36_s10 = int_to_ptr.vmem [resolvable:$true] %s35_s10  ;;  %s64_s12 = int_to_ptr.vmem [resolvable:$true] %s63_s12 }
   0x5   :  { %s2975_s13 = scalar_lea.vmem %s36_s10, 512  ;;  %p2980_p1 = scmp.lt.s32.totalorder %s36_s10, %s36_s10 }
   0x6   :  { %p2976_p0 = scmp.ne.s32.totalorder %s36_s10, %s2975_s13  ;;  %p2981_p2 = scmp.lt.s32.totalorder %s2975_s13, %s2975_s13 }
   0x8   :  { %p2982_p3 = por %p2981_p2, %p2980_p1 }
   0xa   :  { %p2983_p4 = pnand %p2982_p3, %p2976_p0 }
   0xc   :  { %2986 = shalt.err (!%p2983_p4)
}
   0xd   :  { %s3097_s14 = smov 256   ;;  %s3098_s15 = smov 16  }
   0xe   :  { %41 = dma.hbm_to_vmem [thread:$0]  %s3550_s1, 512, %s36_s10, [#allocation7], %s3097_s14, %s3097_s14, %s3098_s15  }
   0xf   :  { %s2995_s18 = scalar_lea.vmem %s64_s12, 12288  ;;  %p3000_p6 = scmp.lt.s32.totalorder %s64_s12, %s64_s12 }
  0x10   :  { %p2996_p5 = scmp.ne.s32.totalorder %s64_s12, %s2995_s18  ;;  %p3001_p7 = scmp.lt.s32.totalorder %s2995_s18, %s2995_s18 }
  0x12   :  { %p3002_p8 = por %p3001_p7, %p3000_p6 }
  0x14   :  { %p3003_p9 = pnand %p3002_p8, %p2996_p5 }
  0x16   :  { %3006 = shalt.err (!%p3003_p9)
}
  0x17   :  { %s3099_s19 = smov 128   ;;  %s3100_s20 = smov 8  }
  0x18   :  { %69 = dma.hbm_to_vmem [thread:$0]  %s3554_s5, 12288, %s64_s12, [#allocation10], %s3099_s19, %s3099_s19, %s3100_s20  }
  0x19   :  { %s3101_s23 = smov [#allocation3]   ;;  %s3102_s25 = smov [#allocation8]  }
  0x1a   :  { %s23_s24 = sshll.u32 %s3101_s23, 4  ;;  %s47_s1 = sshll.u32 %s3102_s25, 4  ;;  %s24_s24 = int_to_ptr.vmem [resolvable:$true] %s23_s24  ;;  %s48_s1 = int_to_ptr.vmem [resolvable:$true] %s47_s1 }
  0x1b   :  { %s3015_s26 = scalar_lea.vmem %s24_s24, 1024  ;;  %p3020_p11 = scmp.lt.s32.totalorder %s24_s24, %s24_s24 }
  0x1c   :  { %p3016_p10 = scmp.ne.s32.totalorder %s24_s24, %s3015_s26  ;;  %p3021_p12 = scmp.lt.s32.totalorder %s3015_s26, %s3015_s26 }
  0x1e   :  { %p3022_p13 = por %p3021_p12, %p3020_p11 }
  0x20   :  { %p3023_p0 = pnand %p3022_p13, %p3016_p10 }
  0x22   :  { %3026 = shalt.err (!%p3023_p0)
}
  0x23   :  { %29 = dma.hbm_to_vmem [thread:$0]  %s3549_s0, 1024, %s24_s24, [#allocation4], %s3097_s14, %s3097_s14, %s3098_s15  }
  0x24   :  { %s3035_s5 = scalar_lea.vmem %s48_s1, 512  ;;  %p3040_p2 = scmp.lt.s32.totalorder %s48_s1, %s48_s1 }
  0x25   :  { %p3036_p1 = scmp.ne.s32.totalorder %s48_s1, %s3035_s5  ;;  %p3041_p3 = scmp.lt.s32.totalorder %s3035_s5, %s3035_s5 }
  0x27   :  { %p3042_p4 = por %p3041_p3, %p3040_p2 }
  0x29   :  { %p3043_p5 = pnand %p3042_p4, %p3036_p1 }
  0x2b   :  { %3046 = shalt.err (!%p3043_p5)
}
  0x2c   :  { %53 = dma.hbm_to_vmem [thread:$0]  %s3551_s2, 512, %s48_s1, [#allocation7], %s3097_s14, %s3097_s14, %s3098_s15  }
  0x2d   :  { %s3103_s10 = smov [#allocation11]  }
  0x2e   :  { %s79_s11 = sshll.u32 %s3103_s10, 4  ;;  %s80_s11 = int_to_ptr.vmem [resolvable:$true] %s79_s11 }
  0x2f   :  { %s3055_s12 = scalar_lea.vmem %s80_s11, 12288  ;;  %p3060_p7 = scmp.lt.s32.totalorder %s80_s11, %s80_s11 }
  0x30   :  { %p3056_p6 = scmp.ne.s32.totalorder %s80_s11, %s3055_s12  ;;  %p3061_p8 = scmp.lt.s32.totalorder %s3055_s12, %s3055_s12 }
  0x32   :  { %p3062_p9 = por %p3061_p8, %p3060_p7 }
  0x34   :  { %p3063_p10 = pnand %p3062_p9, %p3056_p6 }
  0x36   :  { %3066 = shalt.err (!%p3063_p10)
}
  0x37   :  { %85 = dma.hbm_to_vmem [thread:$0]  %s3557_s8, 12288, %s80_s11, [#allocation10], %s3099_s19, %s3099_s19, %s3100_s20  }
  0x38   :  { %3087 = dma.done.wait [#allocation4], 1024  }
  0x39   :  { %3088 = vsyncadd [#allocation4], 4294966272 }
  0x3a   :  { %3089 = dma.done.wait [#allocation7], 1024  }
  0x3b   :  { %3090 = vsyncadd [#allocation7], 4294966272 }
  0x3c   :  { %3091 = dma.done.wait [#allocation10], 24576  }
  0x3d   :  { %3092 = vsyncadd [#allocation10], 4294942720  ;;  %v106_v0 = vld [vmem:[#allocation3 + $0x20] sm:$0xff]  ;;  %v107_v1 = vld [vmem:[#allocation3 + $0x28] sm:$0xff]  ;;  %s3104_s2 = smov 32   ;;  %s3105_s8 = smov 64  }
  0x3e   :  { %v102_v2 = vld [vmem:[#allocation3] sm:$0xff]  ;;  %v116_v3 = vadd.f32 %v107_v1, %v106_v0  ;;  %v103_v4 = vld [vmem:[#allocation3 + $0x8] sm:$0xff]  ;;  %v108_v5 = vld [vmem:[#allocation3 + $0x30] sm:$0xff]  ;;  %vm226_vm3 = vcmask 1040384   ;;  %vm229_vm4 = vcmask 1044484   ;;  %vm493_vm15 = vcmask 1043456  }
  0x3f   :  { %v109_v6 = vld [vmem:[#allocation3 + $0x38] sm:$0xff]  ;;  %v110_v7 = vadd.f32 %v103_v4, %v102_v2  ;;  %v104_v8 = vld [vmem:[#allocation3 + $0x10] sm:$0xff]  ;;  %vm227_vm5 = vsmask.f32 256  ;;  %vm230_vm6 = vsmask.f32 4352 }
  0x40   :  { %v105_v9 = vld [vmem:[#allocation3 + $0x18] sm:$0xff]  ;;  %117 = vadd.xlane.f32.xlu1 %v116_v3  ;;  %v119_v10 = vadd.f32 %v109_v6, %v108_v5  ;;  %vm228_vm7 = vmand %vm226_vm3, %vm227_vm5  ;;  %vm239_vm8 = vsmask.f32 7938  ;;  %vm241_vm10 = vsmask.f32 7954 }
  0x41   :  { %111 = vadd.xlane.f32.xlu0 %v110_v7  ;;  %v113_v11 = vadd.f32 %v105_v9, %v104_v8  ;;  %vm231_vm9 = vmand %vm229_vm4, %vm230_vm6 }
  0x42   :  { %vm3332_vm11 = vmor %vm231_vm9, %vm228_vm7 }
  0x43   :  { %vm240_vm12 = vmand %vm226_vm3, %vm239_vm8  ;;  %vm495_vm3 = vcmask 1047556  }
  0x44   :  { %120 = vadd.xlane.f32.xlu1 %v119_v10  ;;  %v195_v10 = vld [vmem:[#allocation6 + $0x8] sm:$0xff]  ;;  %vm242_vm13 = vmand %vm229_vm4, %vm241_vm10 }
  0x45   :  { %114 = vadd.xlane.f32.xlu0 %v113_v11  ;;  %vm243_vm14 = vmor %vm242_vm13, %vm240_vm12 }
  0x46   :  { %vm494_vm4 = vmand %vm493_vm15, %vm239_vm8  ;;  %vm451_vm8 = vsmask.f32 4368 }
  0x47   :  { %vm496_vm6 = vmand %vm495_vm3, %vm241_vm10  ;;  %vm1040_vm10 = vcmask 1046532  }
  0x48   :  { %vm3346_vm7 = vmor %vm496_vm6, %vm494_vm4 }
  0x49   :  { %vm3384_vm9 = vmor %vm227_vm5, %vm451_vm8  ;;  %vm1039_vm5 = vcmask 1042432  }
  0x4a   :  { %vm3403_vm12 = vmor %vm1039_vm5, %vm1040_vm10 }
  0xc9   :  { %v118_v12 = vpop.xlane.xlu1 %117 }
  0xca   :  { %v112_v13 = vpop.xlane.xlu0 %111 }
  0xcd   :  { %v121_v14 = vpop.xlane.xlu1 %120 }
  0xce   :  { %v129_v15 = vadd.f32 %v121_v14, %v118_v12  ;;  %v115_v16 = vpop.xlane.xlu0 %114  ;;  %v197_v12 = vld [vmem:[#allocation6 + $0x18] sm:$0xff]  ;;  %v196_v14 = vld [vmem:[#allocation6 + $0x10] sm:$0xff] }
  0xcf   :  { %v122_v17 = vadd.f32 %v115_v16, %v112_v13  ;;  %v194_v13 = vld [vmem:[#allocation6] sm:$0xff] }
  0xd0   :  { %v130_v18 = vrot.slane %v129_v15, 4 }
  0xd1   :  { %v123_v19 = vrot.slane %v122_v17, 4 }
  0xd2   :  { %v131_v20 = vadd.f32 %v130_v18, %v129_v15 }
  0xd3   :  { %v124_v21 = vadd.f32 %v123_v19, %v122_v17  ;;  %v207_v19 = vld [vmem:[#allocation8 + $0x8] sm:$0xff] }
  0xd4   :  { %v132_v22 = vrot.slane %v131_v20, 2 }
  0xd5   :  { %v125_v23 = vrot.slane %v124_v21, 2 }
  0xd6   :  { %v133_v24 = vadd.f32 %v132_v22, %v131_v20  ;;  %v209_v20 = vld [vmem:[#allocation8 + $0x18] sm:$0xff] }
  0xd7   :  { %v126_v25 = vadd.f32 %v125_v23, %v124_v21 }
  0xd8   :  { %v134_v26 = vrot.slane %v133_v24, 1 }
  0xd9   :  { %v127_v27 = vrot.slane %v126_v25, 1 }
  0xda   :  { %v135_v28 = vadd.f32 %v134_v26, %v133_v24  ;;  %v208_v26 = vld [vmem:[#allocation8 + $0x10] sm:$0xff] }
  0xdb   :  { %v128_v29 = vadd.f32 %v127_v27, %v126_v25  ;;  %v206_v25 = vld [vmem:[#allocation8] sm:$0xff] }
  0xdc   :  { %v137_v30 = vmul.f32 0.00024414063, %v135_v28 }
  0xdd   :  { %v136_v31 = vmul.f32 0.00024414063, %v128_v29 }
  0xde   :  { %v3188_v32 = vsub.f32 %v108_v5, %v137_v30  ;;  %v3190_v33 = vsub.f32 %v109_v6, %v137_v30  ;;  %v3192_v34 = vsub.f32 %v106_v0, %v137_v30  ;;  %v3194_v35 = vsub.f32 %v107_v1, %v137_v30 }
  0xdf   :  { %v140_v36 = vsub.f32 %v104_v8, %v136_v31  ;;  %v141_v37 = vsub.f32 %v105_v9, %v136_v31  ;;  %v138_v38 = vsub.f32 %v102_v2, %v136_v31  ;;  %v139_v39 = vsub.f32 %v103_v4, %v136_v31 }
  0xe0   :  { %v152_v44 = vmul.f32 %v3188_v32, %v3188_v32  ;;  %v153_v45 = vmul.f32 %v3190_v33, %v3190_v33  ;;  %v150_v48 = vmul.f32 %v3192_v34, %v3192_v34  ;;  %v151_v49 = vmul.f32 %v3194_v35, %v3194_v35 }
  0xe1   :  { %v148_v40 = vmul.f32 %v140_v36, %v140_v36  ;;  %v149_v41 = vmul.f32 %v141_v37, %v141_v37  ;;  %v146_v42 = vmul.f32 %v138_v38, %v138_v38  ;;  %v147_v43 = vmul.f32 %v139_v39, %v139_v39 }
  0xe2   :  { %v163_v50 = vadd.f32 %v153_v45, %v152_v44  ;;  %v160_v51 = vadd.f32 %v151_v49, %v150_v48 }
  0xe3   :  { %v157_v46 = vadd.f32 %v149_v41, %v148_v40  ;;  %v154_v47 = vadd.f32 %v147_v43, %v146_v42 }
  0xe5   :  { %158 = vadd.xlane.f32.xlu1 %v157_v46  ;;  %155 = vadd.xlane.f32.xlu0 %v154_v47 }
  0xe9   :  { %164 = vadd.xlane.f32.xlu1 %v163_v50  ;;  %161 = vadd.xlane.f32.xlu0 %v160_v51 }
 0x16e   :  { %v159_v52 = vpop.xlane.xlu1 %158  ;;  %v156_v53 = vpop.xlane.xlu0 %155 }
 0x16f   :  { %v166_v54 = vadd.f32 %v159_v52, %v156_v53 }
 0x171   :  { %v167_v55 = vrot.slane %v166_v54, 4 }
 0x172   :  { %v165_v56 = vpop.xlane.xlu1 %164  ;;  %v162_v57 = vpop.xlane.xlu0 %161 }
 0x173   :  { %v168_v58 = vadd.f32 %v167_v55, %v166_v54  ;;  %v173_v59 = vadd.f32 %v165_v56, %v162_v57 }
 0x175   :  { %v169_v60 = vrot.slane %v168_v58, 2  ;;  %v174_v61 = vrot.slane %v173_v59, 4 }
 0x177   :  { %v170_v62 = vadd.f32 %v169_v60, %v168_v58  ;;  %v175_v63 = vadd.f32 %v174_v61, %v173_v59 }
 0x179   :  { %v171_v0 = vrot.slane %v170_v62, 1  ;;  %v176_v1 = vrot.slane %v175_v63, 2 }
 0x17b   :  { %v172_v2 = vadd.f32 %v171_v0, %v170_v62  ;;  %v177_v3 = vadd.f32 %v176_v1, %v175_v63  ;;  %v274_v62 = vlaneseq }
 0x17d   :  { %v180_v4 = vmul.f32 0.00024414063, %v172_v2  ;;  %v178_v5 = vrot.slane %v177_v3, 1  ;;  %v3242_v63 = vand.u32 127, %v274_v62 }
 0x17f   :  { %v182_v6 = vadd.f32 1e-05, %v180_v4  ;;  %v179_v7 = vadd.f32 %v178_v5, %v177_v3  ;;  %vm276_vm0 = vcmp.lt.s32.totalorder %v3242_v63, 16  ;;  %vm285_vm1 = vcmp.lt.s32.totalorder %v3242_v63, 32 }
 0x180   :  { %vm294_vm2 = vcmp.lt.s32.totalorder %v3242_v63, 64  ;;  %v1327_v63 = vld [vmem:[%s3556_s7] sm:$0x3] }
 0x181   :  { %2959 = vrsqrt.f32 %v182_v6  ;;  %v181_v8 = vmul.f32 0.00024414063, %v179_v7 }
 0x183   :  { %v183_v9 = vadd.f32 1e-05, %v181_v8 }
 0x185   :  { %2961 = vrsqrt.f32 %v183_v9 }
 0x18e   :  { %v2960_v11 = vpop.eup %2959 }
 0x18f   :  { %v187_v15 = vmul.f32 %v2960_v11, %v139_v39  ;;  %v189_v16 = vmul.f32 %v2960_v11, %v141_v37  ;;  %v186_v17 = vmul.f32 %v2960_v11, %v138_v38  ;;  %v188_v18 = vmul.f32 %v2960_v11, %v140_v36 }
 0x191   :  { %v199_v21 = vmul.f32 %v195_v10, %v187_v15  ;;  %v201_v22 = vmul.f32 %v197_v12, %v189_v16  ;;  %v198_v23 = vmul.f32 %v194_v13, %v186_v17  ;;  %v200_v24 = vmul.f32 %v196_v14, %v188_v18 }
 0x192   :  { %v2962_v27 = vpop.eup %2961 }
 0x193   :  { %v191_v28 = vmul.f32 %v2962_v27, %v3194_v35  ;;  %v193_v29 = vmul.f32 %v2962_v27, %v3190_v33  ;;  %v3206_v30 = vadd.f32 %v207_v19, %v199_v21  ;;  %v3208_v31 = vadd.f32 %v209_v20, %v201_v22 }
 0x194   :  { %v190_v37 = vmul.f32 %v2962_v27, %v3192_v34  ;;  %v192_v36 = vmul.f32 %v2962_v27, %v3188_v32  ;;  %v3212_v38 = vadd.f32 %v206_v25, %v198_v23  ;;  %v3214_v39 = vadd.f32 %v208_v26, %v200_v24 }
 0x195   :  { %v203_v40 = vmul.f32 %v195_v10, %v191_v28  ;;  %v205_v41 = vmul.f32 %v197_v12, %v193_v29  ;;  %219 = vst [vmem:[#allocation12 + $0x8] sm:$0xff] %v3206_v30  ;;  %221 = vst [vmem:[#allocation12 + $0x18] sm:$0xff] %v3208_v31  ;;  %v261_v32 = vadd.f32 %v3208_v31, %v3206_v30  ;;  %v3259_v12 = vshrl.u32 %v274_v62, 7  ;;  %v2688_v62 = vld [vmem:[#allocation9 + $0x70] ss:$8 sps:$4 sm:$0xff]  }
 0x196   :  { %v202_v35 = vmul.f32 %v194_v13, %v190_v37  ;;  %v204_v33 = vmul.f32 %v196_v14, %v192_v36  ;;  %218 = vst [vmem:[#allocation12] sm:$0xff] %v3212_v38  ;;  %220 = vst [vmem:[#allocation12 + $0x10] sm:$0xff] %v3214_v39  ;;  %v252_v45 = vadd.f32 %v3214_v39, %v3212_v38 }
 0x197   :  { %v3220_v42 = vadd.f32 %v207_v19, %v203_v40  ;;  %v3222_v34 = vadd.f32 %v209_v20, %v205_v41  ;;  %v3266_v19 = vsub.s32 0, %v3259_v12 }
 0x198   :  { %v3226_v43 = vadd.f32 %v206_v25, %v202_v35  ;;  %v3228_v44 = vadd.f32 %v208_v26, %v204_v33 }
 0x199   :  { %v262_v46 = vadd.f32 %v261_v32, %v3220_v42  ;;  %223 = vst [vmem:[#allocation12 + $0x28] sm:$0xff] %v3220_v42  ;;  %225 = vst [vmem:[#allocation12 + $0x38] sm:$0xff] %v3222_v34 }
 0x19a   :  { %v253_v47 = vadd.f32 %v252_v45, %v3226_v43  ;;  %222 = vst [vmem:[#allocation12 + $0x20] sm:$0xff] %v3226_v43  ;;  %224 = vst [vmem:[#allocation12 + $0x30] sm:$0xff] %v3228_v44 }
 0x19b   :  { %v263_v48 = vadd.f32 %v262_v46, %v3222_v34 }
 0x19c   :  { %v254_v49 = vadd.f32 %v253_v47, %v3228_v44 }
 0x19d   :  { %v264_v50 = vrot.slane %v263_v48, 4 }
 0x19e   :  { %v255_v51 = vrot.slane %v254_v49, 4 }
 0x19f   :  { %v265_v52 = vadd.f32 %v264_v50, %v263_v48 }
 0x1a0   :  { %v256_v53 = vadd.f32 %v255_v51, %v254_v49 }
 0x1a1   :  { %v266_v54 = vrot.slane %v265_v52, 2 }
 0x1a2   :  { %v257_v55 = vrot.slane %v256_v53, 2 }
 0x1a3   :  { %v267_v56 = vadd.f32 %v266_v54, %v265_v52 }
 0x1a4   :  { %v258_v57 = vadd.f32 %v257_v55, %v256_v53 }
 0x1a5   :  { %v268_v58 = vrot.slane %v267_v56, 1 }
 0x1a6   :  { %v259_v59 = vrot.slane %v258_v57, 1 }
 0x1a7   :  { %v269_v60 = vadd.f32 %v268_v58, %v267_v56  ;;  %v2673_v58 = vld [vmem:[#allocation9 + $0x170] ss:$8 sps:$4 sm:$0xff]  }
 0x1a8   :  { %v260_v61 = vadd.f32 %v259_v59, %v258_v57  ;;  %v2671_v57 = vld [vmem:[#allocation9 + $0x174] ss:$8 sps:$4 sm:$0xff]   ;;  %v2674_v59 = vld [vmem:[#allocation9 + $0x164] ss:$8 sps:$4 sm:$0xff]  }
 0x1a9   :  { %272 = vrot.lane.b32.xlu1 %v269_v60, %s3098_s15  ;;  %741 = vmatprep.subr.bf16.mxu0 %v2671_v57  ;;  %v2727_v57 = vld [vmem:[#allocation9 + $0x1c0] ss:$8 sps:$4 sm:$0xff]  }
 0x1aa   :  { %270 = vrot.lane.b32.xlu0 %v260_v61, %s3098_s15  ;;  %742 = vmatpush1.bf16.msra.mxu0 %v2673_v58  ;;  %v2740_v58 = vld [vmem:[#allocation9 + $0xe4] ss:$8 sps:$4 sm:$0xff]  }
 0x1ab   :  { %743 = vmatprep.subr.bf16.mxu0 %v2674_v59  ;;  %v2742_v59 = vld [vmem:[#allocation9 + $0xe0] ss:$8 sps:$4 sm:$0xff]  }
 0x21b   :  { %v273_v0 = vpop.permute.xlu1 %272 }
 0x21c   :  { %v271_v1 = vpop.permute.xlu0 %270 }
 0x21d   :  { %v278_v2 = vsel %vm276_vm0, %v273_v0, %v271_v1  ;;  %v277_v4 = vsel %vm276_vm0, %v271_v1, %v273_v0  ;;  %v2677_v0 = vld [vmem:[#allocation9 + $0x154] ss:$8 sps:$4 sm:$0xff]   ;;  %v2692_v1 = vld [vmem:[#allocation9 + $0x64] ss:$8 sps:$4 sm:$0xff]  }
 0x21e   :  { %v279_v3 = vadd.f32 %v278_v2, %v260_v61  ;;  %v280_v5 = vadd.f32 %v277_v4, %v269_v60  ;;  %v2676_v60 = vld [vmem:[#allocation9 + $0x160] ss:$8 sps:$4 sm:$0xff]   ;;  %v2686_v61 = vld [vmem:[#allocation9 + $0x74] ss:$8 sps:$4 sm:$0xff]  }
 0x21f   :  { %974 = vmatprep.subr.bf16.mxu1 %v2686_v61  ;;  %744 = vmatpush1.bf16.msra.mxu0 %v2676_v60  ;;  %v2731_v60 = vld [vmem:[#allocation9 + $0x1b4] ss:$8 sps:$4 sm:$0xff]   ;;  %v2733_v61 = vld [vmem:[#allocation9 + $0x1b0] ss:$8 sps:$4 sm:$0xff]  }
 0x220   :  { %281 = vrot.lane.b32.xlu1 %v279_v3, %s3104_s2  ;;  %975 = vmatpush1.bf16.msra.mxu1 %v2688_v62  ;;  %v2746_v62 = vld [vmem:[#allocation9 + $0xd4] ss:$8 sps:$4 sm:$0xff]  }
 0x221   :  { %976 = vmatprep.subr.bf16.mxu1 %v2692_v1  ;;  %745 = vmatprep.subr.bf16.mxu0 %v2677_v0  ;;  %v2748_v0 = vld [vmem:[#allocation9 + $0xd0] ss:$8 sps:$4 sm:$0xff]   ;;  %v2737_v1 = vld [vmem:[#allocation9 + $0x1a4] ss:$8 sps:$4 sm:$0xff]  }
 0x224   :  { %283 = vrot.lane.b32.xlu1 %v280_v5, %s3104_s2 }
 0x292   :  { %v282_v6 = vpop.permute.xlu1 %281 }
 0x296   :  { %v284_v7 = vpop.permute.xlu1 %283 }
 0x297   :  { %v286_v8 = vsel %vm285_vm1, %v282_v6, %v284_v7  ;;  %v287_v9 = vsel %vm285_vm1, %v284_v7, %v282_v6  ;;  %v2679_v6 = vld [vmem:[#allocation9 + $0x150] ss:$8 sps:$4 sm:$0xff]  }
 0x298   :  { %v288_v10 = vadd.f32 %v287_v9, %v279_v3  ;;  %v289_v11 = vadd.f32 %v286_v8, %v280_v5  ;;  %v2680_v9 = vld [vmem:[#allocation9 + $0x144] ss:$8 sps:$4 sm:$0xff]   ;;  %746 = vmatpush1.bf16.msra.mxu0 %v2679_v6  ;;  %v2745_v6 = vld [vmem:[#allocation9 + $0x190] ss:$8 sps:$4 sm:$0xff]  }
 0x299   :  { %747 = vmatprep.subr.bf16.mxu0 %v2680_v9  ;;  %v2749_v9 = vld [vmem:[#allocation9 + $0x184] ss:$8 sps:$4 sm:$0xff]  }
 0x29a   :  { %290 = vrot.lane.b32.xlu0 %v288_v10, %s3105_s8  ;;  %292 = vrot.lane.b32.xlu1 %v289_v11, %s3105_s8 }
 0x30c   :  { %v291_v13 = vpop.permute.xlu0 %290  ;;  %v293_v14 = vpop.permute.xlu1 %292 }
 0x30d   :  { %v295_v15 = vsel %vm294_vm2, %v291_v13, %v293_v14  ;;  %v296_v16 = vsel %vm294_vm2, %v293_v14, %v291_v13  ;;  %v2685_v13 = vld [vmem:[#allocation9 + $0x130] ss:$8 sps:$4 sm:$0xff]   ;;  %v2689_v14 = vld [vmem:[#allocation9 + $0x124] ss:$8 sps:$4 sm:$0xff]  }
 0x30e   :  { %v297_v17 = vadd.f32 %v296_v16, %v288_v10  ;;  %v298_v18 = vadd.f32 %v295_v15, %v289_v11  ;;  %v2682_v10 = vld [vmem:[#allocation9 + $0x140] ss:$8 sps:$4 sm:$0xff]   ;;  %v2683_v11 = vld [vmem:[#allocation9 + $0x134] ss:$8 sps:$4 sm:$0xff]  }
 0x30f   :  { %748 = vmatpush1.bf16.msra.mxu0 %v2682_v10  ;;  %v2691_v15 = vld [vmem:[#allocation9 + $0x120] ss:$8 sps:$4 sm:$0xff]  }
 0x310   :  { %v299_v20 = vadd.f32 %v298_v18, %v297_v17  ;;  %749 = vmatprep.subr.bf16.mxu0 %v2683_v11  ;;  %v2694_v16 = vld [vmem:[#allocation9 + $0x60] ss:$8 sps:$4 sm:$0xff]   ;;  %v2698_v17 = vld [vmem:[#allocation9 + $0x54] ss:$8 sps:$4 sm:$0xff]   ;;  %v2700_v18 = vld [vmem:[#allocation9 + $0x50] ss:$8 sps:$4 sm:$0xff]  }
 0x311   :  { %977 = vmatpush1.bf16.msra.mxu1 %v2694_v16  ;;  %v244_v11 = vld [vmem:[#allocation2 + $0x18] sm:$0x11]  ;;  %v2758_v16 = vld [vmem:[#allocation9 + $0xb4] ss:$8 sps:$4 sm:$0xff]  }
 0x312   :  { %v300_v21 = vmul.f32 0.001953125, %v299_v20  ;;  %978 = vmatprep.subr.bf16.mxu1 %v2698_v17  ;;  %v2704_v20 = vld [vmem:[#allocation9 + $0x44] ss:$8 sps:$4 sm:$0xff]   ;;  %v2751_v17 = vld [vmem:[#allocation9 + $0x180] ss:$8 sps:$4 sm:$0xff]  }
 0x313   :  { %750 = vmatpush1.bf16.msra.mxu0 %v2685_v13 }
 0x314   :  { %v304_v22 = vrot.slane %v300_v21, %v3266_v19  ;;  %751 = vmatprep.subr.bf16.mxu0 %v2689_v14  ;;  %v2706_v21 = vld [vmem:[#allocation9 + $0x40] ss:$8 sps:$4 sm:$0xff]  }
 0x315   :  { %979 = vmatpush1.bf16.msra.mxu1 %v2700_v18  ;;  %v2760_v18 = vld [vmem:[#allocation9 + $0xb0] ss:$8 sps:$4 sm:$0xff]  }
 0x316   :  { %v3270_v23 = vsub.f32 %v3206_v30, %v304_v22  ;;  %v3273_v24 = vsub.f32 %v3208_v31, %v304_v22  ;;  %v3276_v25 = vsub.f32 %v3220_v42, %v304_v22  ;;  %v3279_v26 = vsub.f32 %v3212_v38, %v304_v22  ;;  %980 = vmatprep.subr.bf16.mxu1 %v2704_v20 }
 0x317   :  { %v3282_v27 = vsub.f32 %v3214_v39, %v304_v22  ;;  %v3285_v28 = vsub.f32 %v3226_v43, %v304_v22  ;;  %v3288_v29 = vsub.f32 %v3222_v34, %v304_v22  ;;  %v3295_v37 = vsub.f32 %v3228_v44, %v304_v22  ;;  %752 = vmatpush1.bf16.msra.mxu0 %v2691_v15  ;;  %v2695_v22 = vld [vmem:[#allocation9 + $0x114] ss:$8 sps:$4 sm:$0xff]  }
 0x318   :  { %v314_v30 = vmul.f32 %v3270_v23, %v3270_v23  ;;  %v316_v31 = vmul.f32 %v3273_v24, %v3273_v24  ;;  %v313_v36 = vmul.f32 %v3279_v26, %v3279_v26  ;;  %v318_v39 = vmul.f32 %v3276_v25, %v3276_v25  ;;  %753 = vmatprep.subr.bf16.mxu0 %v2695_v22  ;;  %v247_v15 = vld [vmem:[#allocation2] sm:$0x11]  ;;  %v2764_v22 = vld [vmem:[#allocation9 + $0xa4] ss:$8 sps:$4 sm:$0xff]  }
 0x319   :  { %v315_v38 = vmul.f32 %v3282_v27, %v3282_v27  ;;  %v317_v41 = vmul.f32 %v3285_v28, %v3285_v28  ;;  %v320_v33 = vmul.f32 %v3288_v29, %v3288_v29  ;;  %v319_v34 = vmul.f32 %v3295_v37, %v3295_v37  ;;  %981 = vmatpush1.bf16.msra.mxu1 %v2706_v21 }
 0x31a   :  { %v330_v40 = vadd.f32 %v316_v31, %v314_v30  ;;  %v2697_v30 = vld [vmem:[#allocation9 + $0x110] ss:$8 sps:$4 sm:$0xff]   ;;  %v2710_v31 = vld [vmem:[#allocation9 + $0x34] ss:$8 sps:$4 sm:$0xff]   ;;  %v245_v20 = vsel %vm243_vm14, 0, %v244_v11  ;;  %v248_v21 = vsel %vm243_vm14, 0, %v247_v15 }
 0x31b   :  { %v321_v35 = vadd.f32 %v315_v38, %v313_v36  ;;  %754 = vmatpush1.bf16.msra.mxu0 %v2697_v30  ;;  %v2712_v36 = vld [vmem:[#allocation9 + $0x30] ss:$8 sps:$4 sm:$0xff]   ;;  %v2701_v38 = vld [vmem:[#allocation9 + $0x104] ss:$8 sps:$4 sm:$0xff]   ;;  %982 = vmatprep.subr.bf16.mxu1 %v2710_v31  ;;  %246 = vst [vmem:[#allocation2 + $0x18] sm:$0x11] %v245_v20 }
 0x31c   :  { %v331_v42 = vadd.f32 %v330_v40, %v318_v39  ;;  %v2703_v39 = vld [vmem:[#allocation9 + $0x100] ss:$8 sps:$4 sm:$0xff]   ;;  %755 = vmatprep.subr.bf16.mxu0 %v2701_v38  ;;  %v2716_v40 = vld [vmem:[#allocation9 + $0x24] ss:$8 sps:$4 sm:$0xff]   ;;  %249 = vst [vmem:[#allocation2] sm:$0x11] %v248_v21 }
 0x31d   :  { %v322_v32 = vadd.f32 %v321_v35, %v317_v41  ;;  %983 = vmatpush1.bf16.msra.mxu1 %v2712_v36  ;;  %v2718_v41 = vld [vmem:[#allocation9 + $0x20] ss:$8 sps:$4 sm:$0xff]   ;;  %v2707_v35 = vld [vmem:[#allocation9 + $0x1f4] ss:$8 sps:$4 sm:$0xff]   ;;  %v2772_v38 = vld [vmem:[#allocation9 + $0x90] ss:$8 sps:$4 sm:$0xff]  }
 0x31e   :  { %v332_v43 = vadd.f32 %v331_v42, %v320_v33  ;;  %984 = vmatprep.subr.bf16.mxu1 %v2716_v40  ;;  %v2709_v33 = vld [vmem:[#allocation9 + $0x1f0] ss:$8 sps:$4 sm:$0xff]   ;;  %v2757_v30 = vld [vmem:[#allocation9 + $0x274] ss:$8 sps:$4 sm:$0xff]   ;;  %v2766_v31 = vld [vmem:[#allocation9 + $0xa0] ss:$8 sps:$4 sm:$0xff]  }
 0x31f   :  { %v323_v44 = vadd.f32 %v322_v32, %v319_v34  ;;  %756 = vmatpush1.bf16.msra.mxu0 %v2703_v39  ;;  %v2722_v32 = vld [vmem:[#allocation9 + $0x14] ss:$8 sps:$4 sm:$0xff]   ;;  %v2776_v40 = vld [vmem:[#allocation9 + $0x84] ss:$8 sps:$4 sm:$0xff]   ;;  %v2923_v39 = vld [vmem:[#allocation11 + $0x230] ss:$8 sps:$4 sm:$0xff]  }
 0x320   :  { %v333_v45 = vrot.slane %v332_v43, 4  ;;  %757 = vmatprep.subr.bf16.mxu0 %v2707_v35  ;;  %v2770_v36 = vld [vmem:[#allocation9 + $0x94] ss:$8 sps:$4 sm:$0xff]  }
 0x321   :  { %v324_v46 = vrot.slane %v323_v44, 4  ;;  %985 = vmatpush1.bf16.msra.mxu1 %v2718_v41  ;;  %v2778_v41 = vld [vmem:[#allocation9 + $0x80] ss:$8 sps:$4 sm:$0xff]  }
 0x322   :  { %v334_v47 = vadd.f32 %v333_v45, %v332_v43  ;;  %v2724_v45 = vld [vmem:[#allocation9 + $0x10] ss:$8 sps:$4 sm:$0xff]   ;;  %986 = vmatprep.subr.bf16.mxu1 %v2722_v32 }
 0x323   :  { %v325_v48 = vadd.f32 %v324_v46, %v323_v44  ;;  %758 = vmatpush2.bf16.msra.mxu0 %v2709_v33 }
 0x324   :  { %v335_v49 = vrot.slane %v334_v47, 2 }
 0x325   :  { %v326_v50 = vrot.slane %v325_v48, 2  ;;  %987 = vmatpush1.bf16.msra.mxu1 %v2724_v45 }
 0x326   :  { %v336_v51 = vadd.f32 %v335_v49, %v334_v47  ;;  %v2715_v49 = vld [vmem:[#allocation9 + $0x1e0] ss:$8 sps:$4 sm:$0xff]  }
 0x327   :  { %v327_v52 = vadd.f32 %v326_v50, %v325_v48  ;;  %v2713_v48 = vld [vmem:[#allocation9 + $0x1e4] ss:$8 sps:$4 sm:$0xff]  }
 0x328   :  { %v337_v53 = vrot.slane %v336_v51, 1  ;;  %v2728_v50 = vld [vmem:[#allocation9 + $0x4] ss:$8 sps:$4 sm:$0xff]   ;;  %759 = vmatprep.subr.bf16.mxu0 %v2713_v48 }
 0x329   :  { %v328_v54 = vrot.slane %v327_v52, 1  ;;  %760 = vmatpush2.bf16.msra.mxu0 %v2715_v49  ;;  %988 = vmatprep.subr.bf16.mxu1 %v2728_v50  ;;  %v3106_v49 = vmov 1966171168  }
 0x32a   :  { %v338_v55 = vadd.f32 %v337_v53, %v336_v51  ;;  %v2730_v51 = vld [vmem:[#allocation9] ss:$8 sps:$4 sm:$0xff]   ;;  %v2721_v53 = vld [vmem:[#allocation9 + $0x1d0] ss:$8 sps:$4 sm:$0xff]   ;;  %v370_v50 = vunpack.c.l.s4 %v3106_v49  ;;  %v2925_v49 = vld [vmem:[#allocation11 + $0x234] ss:$8 sps:$4 sm:$0xff]  }
 0x32b   :  { %v329_v56 = vadd.f32 %v328_v54, %v327_v52  ;;  %v2719_v52 = vld [vmem:[#allocation9 + $0x1d4] ss:$8 sps:$4 sm:$0xff]   ;;  %989 = vmatpush1.bf16.msra.mxu1 %v2730_v51 }
 0x32c   :  { %341 = vrot.lane.b32.xlu1 %v338_v55, %s3098_s15  ;;  %761 = vmatprep.subr.bf16.mxu0 %v2719_v52  ;;  %v2734_v54 = vld [vmem:[#allocation9 + $0xf4] ss:$8 sps:$4 sm:$0xff]   ;;  %v371_v51 = vunpack.c.0.s8 %v370_v50 }
 0x32d   :  { %339 = vrot.lane.b32.xlu0 %v329_v56, %s3098_s15  ;;  %762 = vmatpush2.bf16.msra.mxu0 %v2721_v53  ;;  %v2769_v50 = vld [vmem:[#allocation9 + $0x254] ss:$8 sps:$4 sm:$0xff]  }
 0x32e   :  { %990 = vmatprep.subr.bf16.mxu1 %v2734_v54  ;;  %v3357_v52 = vsub.s32 %v371_v51, %v3259_v12 }
 0x39e   :  { %v342_v2 = vpop.permute.xlu1 %341 }
 0x39f   :  { %v340_v3 = vpop.permute.xlu0 %339 }
 0x3a0   :  { %v343_v4 = vsel %vm276_vm0, %v340_v3, %v342_v2  ;;  %v344_v5 = vsel %vm276_vm0, %v342_v2, %v340_v3  ;;  %v2739_v2 = vld [vmem:[#allocation9 + $0x1a0] ss:$8 sps:$4 sm:$0xff]   ;;  %v2743_v3 = vld [vmem:[#allocation9 + $0x194] ss:$8 sps:$4 sm:$0xff]  }
 0x3a1   :  { %v345_v7 = vadd.f32 %v344_v5, %v329_v56  ;;  %v346_v8 = vadd.f32 %v343_v4, %v338_v55  ;;  %v2736_v55 = vld [vmem:[#allocation9 + $0xf0] ss:$8 sps:$4 sm:$0xff]   ;;  %v2725_v56 = vld [vmem:[#allocation9 + $0x1c4] ss:$8 sps:$4 sm:$0xff]   ;;  %v2754_v5 = vld [vmem:[#allocation9 + $0xc0] ss:$8 sps:$4 sm:$0xff]  }
 0x3a2   :  { %991 = vmatpush2.bf16.msra.mxu1 %v2736_v55  ;;  %763 = vmatprep.subr.bf16.mxu0 %v2725_v56  ;;  %v2752_v4 = vld [vmem:[#allocation9 + $0xc4] ss:$8 sps:$4 sm:$0xff]   ;;  %v3365_v56 = vsub.s32 1, %v3259_v12 }
 0x3a3   :  { %347 = vrot.lane.b32.xlu0 %v345_v7, %s3104_s2  ;;  %349 = vrot.lane.b32.xlu1 %v346_v8, %s3104_s2 }
 0x3a4   :  { %764 = vmatpush2.bf16.msra.mxu0 %v2727_v57  ;;  %992 = vmatprep.subr.bf16.mxu1 %v2740_v58  ;;  %v251_v57 = vld [vmem:[%s3553_s4] sm:$0x3] }
 0x3a5   :  { %765 = vmatprep.subr.bf16.mxu0 %v2731_v60 }
 0x3a6   :  { %993 = vmatpush2.bf16.msra.mxu1 %v2742_v59 }
 0x3a7   :  { %994 = vmatprep.subr.bf16.mxu1 %v2746_v62  ;;  %v412_v62 = vrot.slane %v251_v57, %v3365_v56 }
 0x3a8   :  { %766 = vmatpush2.bf16.msra.mxu0 %v2733_v61  ;;  %v408_v61 = vrot.slane %v251_v57, %v3266_v19 }
 0x3a9   :  { %767 = vmatprep.subr.bf16.mxu0 %v2737_v1 }
 0x3aa   :  { %995 = vmatpush2.bf16.msra.mxu1 %v2748_v0 }
 0x3ab   :  { %996 = vmatprep.subr.bf16.mxu1 %v2752_v4 }
 0x3ac   :  { %768 = vmatpush2.bf16.msra.mxu0 %v2739_v2 }
 0x3ad   :  { %769 = vmatprep.subr.bf16.mxu0 %v2743_v3 }
 0x3ae   :  { %997 = vmatpush2.bf16.msra.mxu1 %v2754_v5 }
 0x3af   :  { %998 = vmatprep.subr.bf16.mxu1 %v2758_v16 }
 0x3b0   :  { %770 = vmatpush2.bf16.msra.mxu0 %v2745_v6 }
 0x3b1   :  { %771 = vmatprep.subr.bf16.mxu0 %v2749_v9 }
 0x3b2   :  { %999 = vmatpush2.bf16.msra.mxu1 %v2760_v18 }
 0x3b3   :  { %1000 = vmatprep.subr.bf16.mxu1 %v2764_v22 }
 0x3b4   :  { %772 = vmatpush2.bf16.msra.mxu0 %v2751_v17 }
 0x3b5   :  { %1265 = vmatprep.subr.bf16.mxu0 %v2757_v30  ;;  %v2763_v30 = vld [vmem:[#allocation9 + $0x264] ss:$8 sps:$4 sm:$0xff]  }
 0x3b6   :  { %1001 = vmatpush2.bf16.msra.mxu1 %v2766_v31 }
 0x3b7   :  { %1002 = vmatprep.subr.bf16.mxu1 %v2770_v36 }
 0x3ba   :  { %1003 = vmatpush2.bf16.msra.mxu1 %v2772_v38 }
 0x3bb   :  { %1004 = vmatprep.subr.bf16.mxu1 %v2776_v40 }
 0x3be   :  { %1005 = vmatpush2.bf16.msra.mxu1 %v2778_v41 }
 0x415   :  { %v348_v42 = vpop.permute.xlu0 %347  ;;  %v350_v34 = vpop.permute.xlu1 %349 }
 0x416   :  { %v351_v43 = vsel %vm285_vm1, %v348_v42, %v350_v34  ;;  %v352_v44 = vsel %vm285_vm1, %v350_v34, %v348_v42 }
 0x417   :  { %v3321_v46 = vadd.f32 %v352_v44, %v345_v7  ;;  %v3323_v47 = vadd.f32 %v351_v43, %v346_v8  ;;  %v233_v7 = vld [vmem:[#allocation2 + $0x20] sm:$0x11]  ;;  %v236_v8 = vld [vmem:[#allocation2 + $0x10] sm:$0x11] }
 0x418   :  { %v234_v13 = vsel %vm3332_vm11, 0, %v233_v7  ;;  %v237_v14 = vsel %vm3332_vm11, 0, %v236_v8 }
 0x419   :  { %355 = vrot.lane.b32.xlu0 %v3321_v46, %s3105_s8  ;;  %357 = vrot.lane.b32.xlu1 %v3323_v47, %s3105_s8  ;;  %235 = vst [vmem:[#allocation2 + $0x20] sm:$0x11] %v234_v13  ;;  %238 = vst [vmem:[#allocation2 + $0x10] sm:$0x11] %v237_v14 }
 0x48b   :  { %v356_v35 = vpop.permute.xlu0 %355  ;;  %v358_v33 = vpop.permute.xlu1 %357 }
 0x48c   :  { %v359_v42 = vsel %vm294_vm2, %v356_v35, %v358_v33  ;;  %v360_v34 = vsel %vm294_vm2, %v358_v33, %v356_v35  ;;  %v498_v35 = vld [vmem:[#allocation2 + $0x20] sm:$0xff]  ;;  %v2761_v33 = vld [vmem:[#allocation9 + $0x260] ss:$8 sps:$4 sm:$0xff]  }
 0x48d   :  { %v361_v32 = vadd.f32 %v360_v34, %v3321_v46  ;;  %v362_v43 = vadd.f32 %v359_v42, %v3323_v47  ;;  %v250_v46 = vld [vmem:[%s3552_s3] sm:$0x3] }
 0x48f   :  { %v363_v44 = vadd.f32 %v362_v43, %v361_v32 }
 0x491   :  { %v364_v45 = vmul.f32 0.001953125, %v363_v44 }
 0x493   :  { %v365_v48 = vadd.f32 1e-05, %v364_v45 }
 0x495   :  { %2963 = vrsqrt.f32 %v365_v48  ;;  %v502_v48 = vld [vmem:[#allocation2 + $0x18] sm:$0x11] }
 0x4a2   :  { %v2964_v53 = vpop.eup %2963 }
 0x4a3   :  { %v368_v54 = vcombine.low %v2964_v53, %v2964_v53 }
 0x4a5   :  { %v375_v55 = vrot.slane %v368_v54, %v3357_v52 }
 0x4a7   :  { %v382_v47 = vrot.slane %v375_v55, %v3357_v52 }
 0x4a9   :  { %v384_v58 = vmul.f32 %v382_v47, %v250_v46 }
 0x4ab   :  { %v389_v59 = vrot.slane %v384_v58, %v3266_v19  ;;  %v393_v60 = vrot.slane %v384_v58, %v3365_v56 }
 0x4ad   :  { %v396_v0 = vmul.f32 %v389_v59, %v3279_v26  ;;  %v397_v1 = vmul.f32 %v393_v60, %v3270_v23  ;;  %v398_v12 = vmul.f32 %v389_v59, %v3282_v27  ;;  %v399_v2 = vmul.f32 %v393_v60, %v3273_v24 }
 0x4ae   :  { %v401_v3 = vmul.f32 %v393_v60, %v3276_v25  ;;  %v403_v4 = vmul.f32 %v393_v60, %v3288_v29  ;;  %v400_v5 = vmul.f32 %v389_v59, %v3285_v28  ;;  %v402_v6 = vmul.f32 %v389_v59, %v3295_v37  ;;  %v2755_v37 = vld [vmem:[#allocation9 + $0x270] ss:$8 sps:$4 sm:$0xff]   ;;  %v505_v59 = vld [vmem:[#allocation2 + $0x10] sm:$0xff] }
 0x4af   :  { %v415_v7 = vadd.f32 %v408_v61, %v396_v0  ;;  %v416_v8 = vadd.f32 %v412_v62, %v397_v1  ;;  %v417_v9 = vadd.f32 %v408_v61, %v398_v12  ;;  %v418_v11 = vadd.f32 %v412_v62, %v399_v2  ;;  %v509_v60 = vld [vmem:[#allocation2] sm:$0x11] }
 0x4b0   :  { %v420_v13 = vadd.f32 %v412_v62, %v401_v3  ;;  %v422_v26 = vadd.f32 %v412_v62, %v403_v4  ;;  %v419_v14 = vadd.f32 %v408_v61, %v400_v5  ;;  %v421_v23 = vadd.f32 %v408_v61, %v402_v6  ;;  %v2767_v4 = vld [vmem:[#allocation9 + $0x250] ss:$8 sps:$4 sm:$0xff]  }
 0x4b1   :  { %v423_v15 = vmax.f32 %v415_v7, 0.0  ;;  %v424_v27 = vmax.f32 %v416_v8, 0.0  ;;  %v425_v16 = vmax.f32 %v417_v9, 0.0  ;;  %v426_v24 = vmax.f32 %v418_v11, 0.0  ;;  %v2775_v9 = vld [vmem:[#allocation9 + $0x244] ss:$8 sps:$4 sm:$0xff]  }
 0x4b2   :  { %v428_v17 = vmax.f32 %v420_v13, 0.0  ;;  %v430_v25 = vmax.f32 %v422_v26, 0.0  ;;  %v427_v18 = vmax.f32 %v419_v14, 0.0  ;;  %v429_v29 = vmax.f32 %v421_v23, 0.0  ;;  %v2773_v14 = vld [vmem:[#allocation9 + $0x240] ss:$8 sps:$4 sm:$0xff]  }
 0x4b3   :  { %v432_v20 = vpack.c.bf16 %v426_v24, %v424_v27  ;;  %v2650_v28 = vpack.c.bf16 %v424_v27, %v423_v15  ;;  %v2651_v21 = vpack.c.bf16 %v426_v24, %v425_v16  ;;  %v431_v22 = vpack.c.bf16 %v425_v16, %v423_v15  ;;  %v2781_v23 = vld [vmem:[#allocation9 + $0x234] ss:$8 sps:$4 sm:$0xff]   ;;  %v2779_v27 = vld [vmem:[#allocation9 + $0x230] ss:$8 sps:$4 sm:$0xff]  }
 0x4b4   :  { %v2652_v31 = vpack.c.bf16 %v428_v17, %v427_v18  ;;  %v2653_v36 = vpack.c.bf16 %v430_v25, %v429_v29  ;;  %v434_v41 = vpack.c.bf16 %v430_v25, %v428_v17  ;;  %v433_v5 = vpack.c.bf16 %v429_v29, %v427_v18  ;;  %v2784_v25 = vld [vmem:[#allocation9 + $0x224] ss:$8 sps:$4 sm:$0xff]  }
 0x4b5   :  { %v454_v38 = vshrl.u32 %v2650_v28, 16  ;;  %v462_v40 = vshrl.u32 %v2651_v21, 16  ;;  %773 = vmatprep.mubr.bf16.mxu0 %v432_v20  ;;  %v457_v43 = vshll.u32 %v2650_v28, 16  ;;  %v465_v45 = vshll.u32 %v2651_v21, 16 }
 0x4b6   :  { %774 = vmatmul.mubr.bf16.vlgmr.msra.gmra.mxu0 %v431_v22  ;;  %v471_v42 = vshrl.u32 %v2652_v31, 16  ;;  %v479_v34 = vshrl.u32 %v2653_v36, 16  ;;  %v474_v53 = vshll.u32 %v2652_v31, 16  ;;  %v482_v55 = vshll.u32 %v2653_v36, 16  ;;  %v2782_v22 = vld [vmem:[#allocation9 + $0x220] ss:$8 sps:$4 sm:$0xff]  }
 0x4b7   :  { %v456_v32 = vrot.slane %v454_v38, 7  ;;  %v464_v44 = vrot.slane %v462_v40, 7  ;;  %1266 = vmatpush1.bf16.msra.mxu0 %v2755_v37  ;;  %783 = vmatprep.mubr.bf16.mxu0 %v434_v41  ;;  %v2787_v31 = vld [vmem:[#allocation9 + $0x214] ss:$8 sps:$4 sm:$0xff]   ;;  %v2785_v36 = vld [vmem:[#allocation9 + $0x210] ss:$8 sps:$4 sm:$0xff]  }
 0x4b8   :  { %1267 = vmatprep.subr.bf16.mxu0 %v2763_v30  ;;  %v473_v51 = vrot.slane %v471_v42, 7  ;;  %v481_v54 = vrot.slane %v479_v34, 7  ;;  %v2790_v38 = vld [vmem:[#allocation9 + $0x204] ss:$8 sps:$4 sm:$0xff]   ;;  %v2788_v40 = vld [vmem:[#allocation9 + $0x200] ss:$8 sps:$4 sm:$0xff]  }
 0x4b9   :  { %v459_v46 = vor.u32 %v457_v43, %v456_v32  ;;  %v460_v47 = vrot.slane %v456_v32, 4  ;;  %v467_v57 = vor.u32 %v465_v45, %v464_v44  ;;  %v469_v58 = vrot.slane %v464_v44, 4  ;;  %v2793_v41 = vld [vmem:[#allocation9 + $0x2f4] ss:$8 sps:$4 sm:$0xff]   ;;  %v2794_v42 = vld [vmem:[#allocation9 + $0x2e0] ss:$8 sps:$4 sm:$0xff]  }
 0x4ba   :  { %v476_v61 = vor.u32 %v474_v53, %v473_v51  ;;  %v477_v62 = vrot.slane %v473_v51, 4  ;;  %v484_v0 = vor.u32 %v482_v55, %v481_v54  ;;  %v486_v1 = vrot.slane %v481_v54, 4  ;;  %v2799_v34 = vld [vmem:[#allocation9 + $0x2d4] ss:$8 sps:$4 sm:$0xff]   ;;  %v2797_v32 = vld [vmem:[#allocation9 + $0x2d0] ss:$8 sps:$4 sm:$0xff]  }
 0x4bb   :  { %v468_v12 = vsel %vm3384_vm9, %v460_v47, %v467_v57  ;;  %v499_v2 = vsel %vm3346_vm7, %v459_v46, %v498_v35  ;;  %v503_v3 = vsel %vm3332_vm11, %v469_v58, %v502_v48  ;;  %1268 = vmatpush1.bf16.msra.mxu0 %v2761_v33  ;;  %v2791_v35 = vld [vmem:[#allocation9 + $0x2f0] ss:$8 sps:$4 sm:$0xff]   ;;  %v2796_v33 = vld [vmem:[#allocation9 + $0x2e4] ss:$8 sps:$4 sm:$0xff]   ;;  %v2800_v44 = vld [vmem:[#allocation9 + $0x2c0] ss:$8 sps:$4 sm:$0xff]  }
 0x4bc   :  { %500 = vst [vmem:[#allocation2 + $0x20] sm:$0xff] %v499_v2  ;;  %504 = vst [vmem:[#allocation2 + $0x18] sm:$0x11] %v503_v3  ;;  %1269 = vmatprep.subr.bf16.mxu0 %v2769_v50  ;;  %v3396_v6 = vsel %vm3384_vm9, %v477_v62, %v484_v0  ;;  %v506_v7 = vsel %vm3346_vm7, %v476_v61, %v505_v59  ;;  %v510_v8 = vsel %vm3332_vm11, %v486_v1, %v509_v60  ;;  %v2802_v43 = vld [vmem:[#allocation9 + $0x2c4] ss:$8 sps:$4 sm:$0xff]  }
 0x4bd   :  { %v2467_v11 = vcombine.high %v499_v2, %v468_v12  ;;  %507 = vst [vmem:[#allocation2 + $0x10] sm:$0xff] %v506_v7  ;;  %511 = vst [vmem:[#allocation2] sm:$0x11] %v510_v8  ;;  %v2466_v13 = vcombine.low %v499_v2, %v468_v12  ;;  %v2469_v26 = vcombine.high %v506_v7, %v3396_v6  ;;  %v1044_v15 = vrot.slane %v468_v12, 5  ;;  %v2805_v45 = vld [vmem:[#allocation9 + $0x2b4] ss:$8 sps:$4 sm:$0xff]  }
 0x4be   :  { %784 = vmatmul.mubr.bf16.gmra.mxu0 %v433_v5  ;;  %v2468_v28 = vcombine.low %v506_v7, %v3396_v6  ;;  %v2803_v48 = vld [vmem:[#allocation9 + $0x2b0] ss:$8 sps:$4 sm:$0xff]   ;;  %v2808_v50 = vld [vmem:[#allocation9 + $0x2a4] ss:$8 sps:$4 sm:$0xff]   ;;  %v2806_v51 = vld [vmem:[#allocation9 + $0x2a0] ss:$8 sps:$4 sm:$0xff]  }
 0x4bf   :  { %1006 = vmatprep.mubr.bf16.mxu1 %v2467_v11  ;;  %1270 = vmatpush1.bf16.msra.mxu0 %v2767_v4  ;;  %v1046_v29 = vrot.slane %v1044_v15, 4  ;;  %v2811_v53 = vld [vmem:[#allocation9 + $0x294] ss:$8 sps:$4 sm:$0xff]   ;;  %v2809_v54 = vld [vmem:[#allocation9 + $0x290] ss:$8 sps:$4 sm:$0xff]   ;;  %v1051_v57 = vrot.slane %v3396_v6, 5 }
 0x4c0   :  { %1007 = vmatmul.mubr.bf16.vlgmr.msra.gmra.mxu1 %v2466_v13  ;;  %1271 = vmatprep.subr.bf16.mxu0 %v2775_v9  ;;  %v2814_v47 = vld [vmem:[#allocation9 + $0x284] ss:$8 sps:$4 sm:$0xff]   ;;  %v2812_v60 = vld [vmem:[#allocation9 + $0x280] ss:$8 sps:$4 sm:$0xff]  }
 0x4c1   :  { %1016 = vmatprep.mubr.bf16.mxu1 %v2469_v26  ;;  %v1053_v61 = vrot.slane %v1051_v57, 4 }
 0x4c3   :  { %1272 = vmatpush1.bf16.msra.mxu0 %v2773_v14  ;;  %v1027_v16 = vld [vmem:[#allocation2 + $0x20] sm:$0xee]  ;;  %v1029_v24 = vld [vmem:[#allocation2 + $0x18] sm:$0x11] }
 0x4c4   :  { %1273 = vmatprep.subr.bf16.mxu0 %v2781_v23  ;;  %v2502_v18 = vrot.slane %v1027_v16, 9  ;;  %v1047_v20 = vrot.slane %v1029_v24, 5  ;;  %v1030_v55 = vld [vmem:[#allocation2 + $0x10] sm:$0xee]  ;;  %v1032_v46 = vld [vmem:[#allocation2] sm:$0x11] }
 0x4c5   :  { %v2503_v58 = vrot.slane %v1030_v55, 9  ;;  %v1054_v59 = vrot.slane %v1032_v46, 5 }
 0x4c6   :  { %v1045_v21 = vsel %vm3403_vm12, %v2502_v18, %v1044_v15  ;;  %v1048_v37 = vsel %vm3403_vm12, %v1046_v29, %v1047_v20 }
 0x4c7   :  { %1274 = vmatpush1.bf16.msra.mxu0 %v2779_v27  ;;  %v2505_v30 = vcombine.high %v1045_v21, %v1048_v37  ;;  %v1052_v62 = vsel %vm3403_vm12, %v2503_v58, %v1051_v57  ;;  %v1055_v0 = vsel %vm3403_vm12, %v1053_v61, %v1054_v59  ;;  %v2504_v1 = vcombine.low %v1045_v21, %v1048_v37 }
 0x4c8   :  { %1017 = vmatmul.mubr.bf16.gmra.mxu1 %v2468_v28  ;;  %1275 = vmatprep.subr.bf16.mxu0 %v2784_v25  ;;  %v2507_v12 = vcombine.high %v1052_v62, %v1055_v0  ;;  %v2506_v2 = vcombine.low %v1052_v62, %v1055_v0 }
 0x4c9   :  { %1297 = vmatprep.mubr.bf16.mxu0 %v2505_v30 }
 0x4cb   :  { %1276 = vmatpush1.bf16.msra.mxu0 %v2782_v22 }
 0x4cc   :  { %1277 = vmatprep.subr.bf16.mxu0 %v2787_v31 }
 0x4cf   :  { %1278 = vmatpush1.bf16.msra.mxu0 %v2785_v36 }
 0x4d0   :  { %1279 = vmatprep.subr.bf16.mxu0 %v2790_v38 }
 0x4d3   :  { %1280 = vmatpush1.bf16.msra.mxu0 %v2788_v40 }
 0x4d4   :  { %1281 = vmatprep.subr.bf16.mxu0 %v2793_v41 }
 0x4d7   :  { %1282 = vmatpush2.bf16.msra.mxu0 %v2791_v35 }
 0x4d8   :  { %1283 = vmatprep.subr.bf16.mxu0 %v2796_v33 }
 0x4db   :  { %1284 = vmatpush2.bf16.msra.mxu0 %v2794_v42 }
 0x4dc   :  { %1285 = vmatprep.subr.bf16.mxu0 %v2799_v34 }
 0x4df   :  { %1286 = vmatpush2.bf16.msra.mxu0 %v2797_v32 }
 0x4e0   :  { %1287 = vmatprep.subr.bf16.mxu0 %v2802_v43 }
 0x4e3   :  { %1288 = vmatpush2.bf16.msra.mxu0 %v2800_v44 }
 0x4e4   :  { %1289 = vmatprep.subr.bf16.mxu0 %v2805_v45 }
 0x4e7   :  { %1290 = vmatpush2.bf16.msra.mxu0 %v2803_v48 }
 0x4e8   :  { %1291 = vmatprep.subr.bf16.mxu0 %v2808_v50 }
 0x4eb   :  { %1292 = vmatpush2.bf16.msra.mxu0 %v2806_v51 }
 0x4ec   :  { %1293 = vmatprep.subr.bf16.mxu0 %v2811_v53 }
 0x4ef   :  { %1294 = vmatpush2.bf16.msra.mxu0 %v2809_v54 }
 0x4f0   :  { %1295 = vmatprep.subr.bf16.mxu0 %v2814_v47 }
 0x4f3   :  { %1296 = vmatpush2.bf16.msra.mxu0 %v2812_v60 }
 0x4f6   :  { %1298 = vmatmul.mubr.bf16.vlgmr.msra.gmra.mxu0 %v2504_v1 }
 0x4f7   :  { %1307 = vmatprep.mubr.bf16.mxu0 %v2507_v12 }
 0x4fe   :  { %1308 = vmatmul.mubr.bf16.gmra.mxu0 %v2506_v2 }
 0x576   :  { %v775_v3 = vpop.f32.mrf.mxu0 }
 0x578   :  { %v777_v4 = vpop.f32.mrf.mxu0 }
 0x57a   :  { %v779_v5 = vpop.f32.mrf.mxu0 }
 0x57c   :  { %v781_v6 = vpop.f32.mrf.mxu0 }
 0x57e   :  { %v785_v8 = vpop.f32.mrf.mxu0 }
 0x580   :  { %v1008_v7 = vpop.f32.mrf.mxu1  ;;  %v787_v11 = vpop.f32.mrf.mxu0 }
 0x581   :  { %v1009_v28 = vadd.f32 %v1008_v7, %v775_v3 }
 0x582   :  { %v1010_v9 = vpop.f32.mrf.mxu1  ;;  %v789_v26 = vpop.f32.mrf.mxu0 }
 0x583   :  { %v1011_v30 = vadd.f32 %v1010_v9, %v777_v4 }
 0x584   :  { %v1012_v13 = vpop.f32.mrf.mxu1  ;;  %v791_v23 = vpop.f32.mrf.mxu0 }
 0x585   :  { %v1013_v18 = vadd.f32 %v1012_v13, %v779_v5 }
 0x586   :  { %v1014_v14 = vpop.f32.mrf.mxu1 }
 0x587   :  { %v1015_v21 = vadd.f32 %v1014_v14, %v781_v6 }
 0x588   :  { %v1018_v15 = vpop.f32.mrf.mxu1 }
 0x589   :  { %v1019_v37 = vadd.f32 %v1018_v15, %v785_v8 }
 0x58a   :  { %v1020_v16 = vpop.f32.mrf.mxu1 }
 0x58b   :  { %v1021_v36 = vadd.f32 %v1020_v16, %v787_v11 }
 0x58c   :  { %v1022_v29 = vpop.f32.mrf.mxu1 }
 0x58d   :  { %v1023_v42 = vadd.f32 %v1022_v29, %v789_v26 }
 0x58e   :  { %v1024_v35 = vpop.f32.mrf.mxu1 }
 0x58f   :  { %v1025_v45 = vadd.f32 %v1024_v35, %v791_v23 }
 0x5b6   :  { %v1299_v27 = vpop.f32.mrf.mxu0 }
 0x5b7   :  { %v1318_v38 = vadd.f32 %v1299_v27, %v1009_v28 }
 0x5b8   :  { %v1301_v24 = vpop.f32.mrf.mxu0 }
 0x5b9   :  { %v1319_v34 = vadd.f32 %v1301_v24, %v1011_v30 }
 0x5ba   :  { %v1303_v25 = vpop.f32.mrf.mxu0 }
 0x5bb   :  { %v3417_v22 = vadd.f32 %v1303_v25, %v1013_v18 }
 0x5bc   :  { %v1305_v20 = vpop.f32.mrf.mxu0 }
 0x5bd   :  { %v1321_v40 = vadd.f32 %v1305_v20, %v1015_v21  ;;  %v1328_v32 = vadd.f32 %v3417_v22, %v1318_v38 }
 0x5be   :  { %v1309_v31 = vpop.f32.mrf.mxu0 }
 0x5bf   :  { %v1322_v41 = vadd.f32 %v1309_v31, %v1019_v37  ;;  %v1337_v48 = vadd.f32 %v1321_v40, %v1319_v34 }
 0x5c0   :  { %v1311_v33 = vpop.f32.mrf.mxu0 }
 0x5c1   :  { %v1323_v43 = vadd.f32 %v1311_v33, %v1021_v36  ;;  %v1329_v50 = vadd.f32 %v1328_v32, %v1322_v41 }
 0x5c2   :  { %v1313_v44 = vpop.f32.mrf.mxu0 }
 0x5c3   :  { %v1324_v51 = vadd.f32 %v1313_v44, %v1023_v42  ;;  %v1338_v54 = vadd.f32 %v1337_v48, %v1323_v43 }
 0x5c4   :  { %v1315_v53 = vpop.f32.mrf.mxu0 }
 0x5c5   :  { %v1330_v55 = vadd.f32 %v1329_v50, %v1324_v51  ;;  %v1325_v46 = vadd.f32 %v1315_v53, %v1025_v45 }
 0x5c7   :  { %v1331_v47 = vrot.slane %v1330_v55, 4  ;;  %v1339_v57 = vadd.f32 %v1338_v54, %v1325_v46 }
 0x5c9   :  { %v1332_v58 = vadd.f32 %v1331_v47, %v1330_v55  ;;  %v1340_v59 = vrot.slane %v1339_v57, 4 }
 0x5cb   :  { %v1341_v60 = vadd.f32 %v1340_v59, %v1339_v57  ;;  %v1333_v61 = vrot.slane %v1332_v58, 2 }
 0x5cd   :  { %v1334_v62 = vadd.f32 %v1333_v61, %v1332_v58  ;;  %v1342_v0 = vrot.slane %v1341_v60, 2 }
 0x5cf   :  { %v1335_v1 = vrot.slane %v1334_v62, 1  ;;  %v1343_v12 = vadd.f32 %v1342_v0, %v1341_v60 }
 0x5d1   :  { %v1336_v2 = vadd.f32 %v1335_v1, %v1334_v62  ;;  %v1344_v3 = vrot.slane %v1343_v12, 1 }
 0x5d3   :  { %1346 = vrot.lane.b32.xlu0 %v1336_v2, %s3098_s15  ;;  %v1345_v4 = vadd.f32 %v1344_v3, %v1343_v12 }
 0x5d5   :  { %1348 = vrot.lane.b32.xlu1 %v1345_v4, %s3098_s15 }
 0x645   :  { %v1347_v5 = vpop.permute.xlu0 %1346 }
 0x647   :  { %v1349_v6 = vpop.permute.xlu1 %1348 }
 0x648   :  { %v1350_v7 = vsel %vm276_vm0, %v1347_v5, %v1349_v6  ;;  %v1351_v8 = vsel %vm276_vm0, %v1349_v6, %v1347_v5  ;;  %v2817_v5 = vld [vmem:[#allocation11 + $0x174] ss:$8 sps:$4 sm:$0xff]   ;;  %v2820_v6 = vld [vmem:[#allocation11 + $0x164] ss:$8 sps:$4 sm:$0xff]  }
 0x649   :  { %v1352_v9 = vadd.f32 %v1351_v8, %v1336_v2  ;;  %v1353_v11 = vadd.f32 %v1350_v7, %v1345_v4  ;;  %v2815_v4 = vld [vmem:[#allocation11 + $0x170] ss:$8 sps:$4 sm:$0xff]   ;;  %1805 = vmatprep.subr.bf16.mxu1 %v2817_v5  ;;  %v2818_v7 = vld [vmem:[#allocation11 + $0x160] ss:$8 sps:$4 sm:$0xff]  }
 0x64a   :  { %1806 = vmatpush1.bf16.msra.mxu1 %v2815_v4  ;;  %v2830_v8 = vld [vmem:[#allocation11 + $0x70] ss:$8 sps:$4 sm:$0xff]   ;;  %v2865_v4 = vld [vmem:[#allocation11 + $0x1d4] ss:$8 sps:$4 sm:$0xff]  }
 0x64b   :  { %1354 = vrot.lane.b32.xlu0 %v1352_v9, %s3104_s2  ;;  %1356 = vrot.lane.b32.xlu1 %v1353_v11, %s3104_s2  ;;  %v2863_v5 = vld [vmem:[#allocation11 + $0x1d0] ss:$8 sps:$4 sm:$0xff]  }
 0x64c   :  { %1807 = vmatprep.subr.bf16.mxu1 %v2820_v6  ;;  %v2880_v6 = vld [vmem:[#allocation11 + $0xf4] ss:$8 sps:$4 sm:$0xff]  }
 0x64e   :  { %1808 = vmatpush1.bf16.msra.mxu1 %v2818_v7  ;;  %v2878_v7 = vld [vmem:[#allocation11 + $0xf0] ss:$8 sps:$4 sm:$0xff]  }
 0x6bd   :  { %v1355_v13 = vpop.permute.xlu0 %1354  ;;  %v1357_v26 = vpop.permute.xlu1 %1356 }
 0x6be   :  { %v1358_v14 = vsel %vm285_vm1, %v1355_v13, %v1357_v26  ;;  %v1359_v23 = vsel %vm285_vm1, %v1357_v26, %v1355_v13  ;;  %v2838_v26 = vld [vmem:[#allocation11 + $0x64] ss:$8 sps:$4 sm:$0xff]  }
 0x6bf   :  { %v1360_v15 = vadd.f32 %v1359_v23, %v1352_v9  ;;  %v1361_v27 = vadd.f32 %v1358_v14, %v1353_v11  ;;  %v2832_v9 = vld [vmem:[#allocation11 + $0x74] ss:$8 sps:$4 sm:$0xff]  }
 0x6c0   :  { %v2823_v11 = vld [vmem:[#allocation11 + $0x154] ss:$8 sps:$4 sm:$0xff]   ;;  %2038 = vmatprep.subr.bf16.mxu0 %v2832_v9  ;;  %v2869_v9 = vld [vmem:[#allocation11 + $0x1c0] ss:$8 sps:$4 sm:$0xff]  }
 0x6c1   :  { %1362 = vrot.lane.b32.xlu0 %v1360_v15, %s3105_s8  ;;  %1364 = vrot.lane.b32.xlu1 %v1361_v27, %s3105_s8 }
 0x6c2   :  { %2039 = vmatpush1.bf16.msra.mxu0 %v2830_v8  ;;  %1809 = vmatprep.subr.bf16.mxu1 %v2823_v11  ;;  %v2871_v8 = vld [vmem:[#allocation11 + $0x1c4] ss:$8 sps:$4 sm:$0xff]  }
 0x6c3   :  { %2040 = vmatprep.subr.bf16.mxu0 %v2838_v26  ;;  %v2886_v11 = vld [vmem:[#allocation11 + $0xe4] ss:$8 sps:$4 sm:$0xff]   ;;  %v2877_v26 = vld [vmem:[#allocation11 + $0x1b4] ss:$8 sps:$4 sm:$0xff]  }
 0x733   :  { %v1363_v16 = vpop.permute.xlu0 %1362  ;;  %v1365_v24 = vpop.permute.xlu1 %1364 }
 0x734   :  { %v1366_v25 = vsel %vm294_vm2, %v1363_v16, %v1365_v24  ;;  %v1367_v18 = vsel %vm294_vm2, %v1365_v24, %v1363_v16  ;;  %v2836_v16 = vld [vmem:[#allocation11 + $0x60] ss:$8 sps:$4 sm:$0xff]  }
 0x735   :  { %v1368_v29 = vadd.f32 %v1367_v18, %v1360_v15  ;;  %v1369_v20 = vadd.f32 %v1366_v25, %v1361_v27  ;;  %v2821_v27 = vld [vmem:[#allocation11 + $0x150] ss:$8 sps:$4 sm:$0xff]   ;;  %v2826_v18 = vld [vmem:[#allocation11 + $0x144] ss:$8 sps:$4 sm:$0xff]   ;;  %2041 = vmatpush1.bf16.msra.mxu0 %v2836_v16  ;;  %v2881_v16 = vld [vmem:[#allocation11 + $0x1a0] ss:$8 sps:$4 sm:$0xff]  }
 0x736   :  { %1810 = vmatpush1.bf16.msra.mxu1 %v2821_v27  ;;  %v2883_v27 = vld [vmem:[#allocation11 + $0x1a4] ss:$8 sps:$4 sm:$0xff]  }
 0x737   :  { %v1370_v28 = vadd.f32 %v1369_v20, %v1368_v29  ;;  %v2824_v29 = vld [vmem:[#allocation11 + $0x140] ss:$8 sps:$4 sm:$0xff]   ;;  %1811 = vmatprep.subr.bf16.mxu1 %v2826_v18  ;;  %v2829_v20 = vld [vmem:[#allocation11 + $0x134] ss:$8 sps:$4 sm:$0xff]   ;;  %v2887_v18 = vld [vmem:[#allocation11 + $0x190] ss:$8 sps:$4 sm:$0xff]  }
 0x739   :  { %v1371_v21 = vmul.f32 0.001953125, %v1370_v28  ;;  %v2827_v28 = vld [vmem:[#allocation11 + $0x130] ss:$8 sps:$4 sm:$0xff]  }
 0x73a   :  { %1812 = vmatpush1.bf16.msra.mxu1 %v2824_v29  ;;  %v2889_v29 = vld [vmem:[#allocation11 + $0x194] ss:$8 sps:$4 sm:$0xff]  }
 0x73b   :  { %v1375_v37 = vrot.slane %v1371_v21, %v3266_v19  ;;  %1813 = vmatprep.subr.bf16.mxu1 %v2829_v20  ;;  %v2835_v21 = vld [vmem:[#allocation11 + $0x124] ss:$8 sps:$4 sm:$0xff]  }
 0x73c   :  { %v2895_v20 = vld [vmem:[#allocation11 + $0x184] ss:$8 sps:$4 sm:$0xff]  }
 0x73d   :  { %v3439_v30 = vsub.f32 %v1319_v34, %v1375_v37  ;;  %v3441_v31 = vsub.f32 %v1321_v40, %v1375_v37  ;;  %v3443_v36 = vsub.f32 %v1323_v43, %v1375_v37  ;;  %v3445_v35 = vsub.f32 %v1318_v38, %v1375_v37 }
 0x73e   :  { %v3448_v33 = vsub.f32 %v3417_v22, %v1375_v37  ;;  %v3450_v42 = vsub.f32 %v1322_v41, %v1375_v37  ;;  %v3452_v32 = vsub.f32 %v1325_v46, %v1375_v37  ;;  %v3458_v45 = vsub.f32 %v1324_v51, %v1375_v37  ;;  %1814 = vmatpush1.bf16.msra.mxu1 %v2827_v28  ;;  %v2833_v37 = vld [vmem:[#allocation11 + $0x120] ss:$8 sps:$4 sm:$0xff]   ;;  %v2904_v28 = vld [vmem:[#allocation11 + $0xb4] ss:$8 sps:$4 sm:$0xff]  }
 0x73f   :  { %v1385_v44 = vmul.f32 %v3439_v30, %v3439_v30  ;;  %v1387_v34 = vmul.f32 %v3441_v31, %v3441_v31  ;;  %v1384_v40 = vmul.f32 %v3445_v35, %v3445_v35  ;;  %v1389_v22 = vmul.f32 %v3443_v36, %v3443_v36  ;;  %1815 = vmatprep.subr.bf16.mxu1 %v2835_v21  ;;  %v2893_v21 = vld [vmem:[#allocation11 + $0x180] ss:$8 sps:$4 sm:$0xff]  }
 0x740   :  { %v1386_v38 = vmul.f32 %v3448_v33, %v3448_v33  ;;  %v1388_v43 = vmul.f32 %v3450_v42, %v3450_v42  ;;  %v1391_v50 = vmul.f32 %v3452_v32, %v3452_v32  ;;  %v1390_v51 = vmul.f32 %v3458_v45, %v3458_v45 }
 0x741   :  { %v1401_v41 = vadd.f32 %v1387_v34, %v1385_v44  ;;  %v2844_v44 = vld [vmem:[#allocation11 + $0x54] ss:$8 sps:$4 sm:$0xff]   ;;  %v2842_v34 = vld [vmem:[#allocation11 + $0x50] ss:$8 sps:$4 sm:$0xff]  }
 0x742   :  { %v1392_v48 = vadd.f32 %v1386_v38, %v1384_v40  ;;  %1816 = vmatpush1.bf16.msra.mxu1 %v2833_v37  ;;  %2042 = vmatprep.subr.bf16.mxu0 %v2844_v44  ;;  %v2850_v40 = vld [vmem:[#allocation11 + $0x44] ss:$8 sps:$4 sm:$0xff]   ;;  %v2848_v38 = vld [vmem:[#allocation11 + $0x40] ss:$8 sps:$4 sm:$0xff]   ;;  %v2902_v37 = vld [vmem:[#allocation11 + $0xb0] ss:$8 sps:$4 sm:$0xff]  }
 0x743   :  { %v1402_v53 = vadd.f32 %v1401_v41, %v1389_v22  ;;  %2043 = vmatpush1.bf16.msra.mxu0 %v2842_v34  ;;  %v2841_v22 = vld [vmem:[#allocation11 + $0x114] ss:$8 sps:$4 sm:$0xff]   ;;  %v2839_v41 = vld [vmem:[#allocation11 + $0x110] ss:$8 sps:$4 sm:$0xff]   ;;  %v2910_v44 = vld [vmem:[#allocation11 + $0xa4] ss:$8 sps:$4 sm:$0xff]  }
 0x744   :  { %v1393_v54 = vadd.f32 %v1392_v48, %v1388_v43  ;;  %2044 = vmatprep.subr.bf16.mxu0 %v2850_v40  ;;  %1817 = vmatprep.subr.bf16.mxu1 %v2841_v22  ;;  %v2856_v43 = vld [vmem:[#allocation11 + $0x34] ss:$8 sps:$4 sm:$0xff]   ;;  %v2854_v48 = vld [vmem:[#allocation11 + $0x30] ss:$8 sps:$4 sm:$0xff]   ;;  %v2908_v40 = vld [vmem:[#allocation11 + $0xa0] ss:$8 sps:$4 sm:$0xff]  }
 0x745   :  { %v1403_v55 = vadd.f32 %v1402_v53, %v1391_v50  ;;  %v2847_v50 = vld [vmem:[#allocation11 + $0x104] ss:$8 sps:$4 sm:$0xff]   ;;  %v2845_v53 = vld [vmem:[#allocation11 + $0x100] ss:$8 sps:$4 sm:$0xff]   ;;  %v2901_v34 = vld [vmem:[#allocation11 + $0x274] ss:$8 sps:$4 sm:$0xff]  }
 0x746   :  { %v1394_v46 = vadd.f32 %v1393_v54, %v1390_v51  ;;  %1818 = vmatpush1.bf16.msra.mxu1 %v2839_v41  ;;  %v2862_v51 = vld [vmem:[#allocation11 + $0x24] ss:$8 sps:$4 sm:$0xff]   ;;  %v2860_v54 = vld [vmem:[#allocation11 + $0x20] ss:$8 sps:$4 sm:$0xff]   ;;  %v2914_v22 = vld [vmem:[#allocation11 + $0x90] ss:$8 sps:$4 sm:$0xff]  }
 0x747   :  { %v1404_v47 = vrot.slane %v1403_v55, 4  ;;  %2045 = vmatpush1.bf16.msra.mxu0 %v2848_v38  ;;  %1819 = vmatprep.subr.bf16.mxu1 %v2847_v50  ;;  %v2916_v38 = vld [vmem:[#allocation11 + $0x94] ss:$8 sps:$4 sm:$0xff]   ;;  %v2922_v41 = vld [vmem:[#allocation11 + $0x84] ss:$8 sps:$4 sm:$0xff]  }
 0x748   :  { %v1395_v57 = vrot.slane %v1394_v46, 4  ;;  %2046 = vmatprep.subr.bf16.mxu0 %v2856_v43  ;;  %v2920_v43 = vld [vmem:[#allocation11 + $0x80] ss:$8 sps:$4 sm:$0xff]  }
 0x749   :  { %v1405_v58 = vadd.f32 %v1404_v47, %v1403_v55  ;;  %v2853_v55 = vld [vmem:[#allocation11 + $0x1f4] ss:$8 sps:$4 sm:$0xff]  }
 0x74a   :  { %v1396_v59 = vadd.f32 %v1395_v57, %v1394_v46  ;;  %1820 = vmatpush1.bf16.msra.mxu1 %v2845_v53  ;;  %v2851_v46 = vld [vmem:[#allocation11 + $0x1f0] ss:$8 sps:$4 sm:$0xff]  }
 0x74b   :  { %v1406_v60 = vrot.slane %v1405_v58, 2  ;;  %2047 = vmatpush1.bf16.msra.mxu0 %v2854_v48  ;;  %1821 = vmatprep.subr.bf16.mxu1 %v2853_v55 }
 0x74c   :  { %v1397_v61 = vrot.slane %v1396_v59, 2  ;;  %2048 = vmatprep.subr.bf16.mxu0 %v2862_v51 }
 0x74d   :  { %v1407_v62 = vadd.f32 %v1406_v60, %v1405_v58  ;;  %v2868_v58 = vld [vmem:[#allocation11 + $0x14] ss:$8 sps:$4 sm:$0xff]  }
 0x74e   :  { %v1398_v0 = vadd.f32 %v1397_v61, %v1396_v59  ;;  %1822 = vmatpush2.bf16.msra.mxu1 %v2851_v46  ;;  %v2866_v61 = vld [vmem:[#allocation11 + $0x10] ss:$8 sps:$4 sm:$0xff]  }
 0x74f   :  { %v1408_v1 = vrot.slane %v1407_v62, 1  ;;  %2049 = vmatpush1.bf16.msra.mxu0 %v2860_v54 }
 0x750   :  { %v1399_v12 = vrot.slane %v1398_v0, 1  ;;  %2050 = vmatprep.subr.bf16.mxu0 %v2868_v58 }
 0x751   :  { %v1409_v2 = vadd.f32 %v1408_v1, %v1407_v62  ;;  %v2859_v1 = vld [vmem:[#allocation11 + $0x1e4] ss:$8 sps:$4 sm:$0xff]  }
 0x752   :  { %v1400_v3 = vadd.f32 %v1399_v12, %v1398_v0  ;;  %v2857_v12 = vld [vmem:[#allocation11 + $0x1e0] ss:$8 sps:$4 sm:$0xff]   ;;  %1823 = vmatprep.subr.bf16.mxu1 %v2859_v1 }
 0x753   :  { %1412 = vrot.lane.b32.xlu1 %v1409_v2, %s3098_s15  ;;  %2051 = vmatpush1.bf16.msra.mxu0 %v2866_v61  ;;  %v1326_v61 = vld [vmem:[%s3555_s6] sm:$0x3]  ;;  %s3107_s6 = smov [#allocation12]  }
 0x754   :  { %1410 = vrot.lane.b32.xlu0 %v1400_v3, %s3098_s15  ;;  %1824 = vmatpush2.bf16.msra.mxu1 %v2857_v12  ;;  %s2416_s7 = sshll.u32 %s3107_s6, 4  ;;  %s2417_s7 = int_to_ptr.vmem [resolvable:$true] %s2416_s7 }
 0x755   :  { %1825 = vmatprep.subr.bf16.mxu1 %v2865_v4  ;;  %s3067_s22 = scalar_lea.vmem %s2417_s7, 1024  ;;  %p3072_p12 = scmp.lt.s32.totalorder %s2417_s7, %s2417_s7 }
 0x756   :  { %p3068_p11 = scmp.ne.s32.totalorder %s2417_s7, %s3067_s22  ;;  %p3073_p13 = scmp.lt.s32.totalorder %s3067_s22, %s3067_s22 }
 0x758   :  { %1826 = vmatpush2.bf16.msra.mxu1 %v2863_v5  ;;  %p3074_p0 = por %p3073_p13, %p3072_p12 }
 0x759   :  { %1827 = vmatprep.subr.bf16.mxu1 %v2871_v8 }
 0x75a   :  { %p3075_p1 = pnand %p3074_p0, %p3068_p11 }
 0x75c   :  { %1828 = vmatpush2.bf16.msra.mxu1 %v2869_v9 }
 0x75d   :  { %1829 = vmatprep.subr.bf16.mxu1 %v2877_v26 }
 0x7c5   :  { %v1413_v13 = vpop.permute.xlu1 %1412 }
 0x7c6   :  { %v1411_v14 = vpop.permute.xlu0 %1410 }
 0x7c7   :  { %v1414_v23 = vsel %vm276_vm0, %v1411_v14, %v1413_v13  ;;  %v1415_v15 = vsel %vm276_vm0, %v1413_v13, %v1411_v14  ;;  %v2884_v13 = vld [vmem:[#allocation11 + $0xe0] ss:$8 sps:$4 sm:$0xff]   ;;  %v2875_v14 = vld [vmem:[#allocation11 + $0x1b0] ss:$8 sps:$4 sm:$0xff]  }
 0x7c8   :  { %v1416_v24 = vadd.f32 %v1415_v15, %v1400_v3  ;;  %v1417_v25 = vadd.f32 %v1414_v23, %v1409_v2  ;;  %v2874_v2 = vld [vmem:[#allocation11 + $0x4] ss:$8 sps:$4 sm:$0xff]   ;;  %v2872_v3 = vld [vmem:[#allocation11] ss:$8 sps:$4 sm:$0xff]   ;;  %v2892_v23 = vld [vmem:[#allocation11 + $0xd4] ss:$8 sps:$4 sm:$0xff]   ;;  %1830 = vmatpush2.bf16.msra.mxu1 %v2875_v14 }
 0x7c9   :  { %2052 = vmatprep.subr.bf16.mxu0 %v2874_v2  ;;  %v2890_v15 = vld [vmem:[#allocation11 + $0xd0] ss:$8 sps:$4 sm:$0xff]   ;;  %1831 = vmatprep.subr.bf16.mxu1 %v2883_v27  ;;  %v1479_v2 = vrot.slane %v1327_v63, %v3266_v19 }
 0x7ca   :  { %1418 = vrot.lane.b32.xlu0 %v1416_v24, %s3104_s2  ;;  %1420 = vrot.lane.b32.xlu1 %v1417_v25, %s3104_s2 }
 0x7cb   :  { %2053 = vmatpush1.bf16.msra.mxu0 %v2872_v3  ;;  %v1483_v3 = vrot.slane %v1327_v63, %v3365_v56 }
 0x7cc   :  { %2054 = vmatprep.subr.bf16.mxu0 %v2880_v6  ;;  %1832 = vmatpush2.bf16.msra.mxu1 %v2881_v16 }
 0x7cd   :  { %1833 = vmatprep.subr.bf16.mxu1 %v2889_v29 }
 0x7cf   :  { %2055 = vmatpush2.bf16.msra.mxu0 %v2878_v7 }
 0x7d0   :  { %2056 = vmatprep.subr.bf16.mxu0 %v2886_v11  ;;  %1834 = vmatpush2.bf16.msra.mxu1 %v2887_v18 }
 0x7d1   :  { %1835 = vmatprep.subr.bf16.mxu1 %v2895_v20  ;;  %v2907_v20 = vld [vmem:[#allocation11 + $0x264] ss:$8 sps:$4 sm:$0xff]  }
 0x7d3   :  { %2057 = vmatpush2.bf16.msra.mxu0 %v2884_v13 }
 0x7d4   :  { %2058 = vmatprep.subr.bf16.mxu0 %v2892_v23  ;;  %1836 = vmatpush2.bf16.msra.mxu1 %v2893_v21 }
 0x7d5   :  { %2326 = vmatprep.subr.bf16.mxu1 %v2901_v34 }
 0x7d7   :  { %2059 = vmatpush2.bf16.msra.mxu0 %v2890_v15 }
 0x83c   :  { %v1419_v47 = vpop.permute.xlu0 %1418  ;;  %v1421_v57 = vpop.permute.xlu1 %1420 }
 0x83d   :  { %v1422_v59 = vsel %vm285_vm1, %v1419_v47, %v1421_v57  ;;  %v1423_v60 = vsel %vm285_vm1, %v1421_v57, %v1419_v47 }
 0x83e   :  { %v3484_v62 = vadd.f32 %v1423_v60, %v1416_v24  ;;  %v3486_v0 = vadd.f32 %v1422_v59, %v1417_v25  ;;  %v2898_v24 = vld [vmem:[#allocation11 + $0xc4] ss:$8 sps:$4 sm:$0xff]   ;;  %v2896_v25 = vld [vmem:[#allocation11 + $0xc0] ss:$8 sps:$4 sm:$0xff]  }
 0x83f   :  { %2060 = vmatprep.subr.bf16.mxu0 %v2898_v24 }
 0x840   :  { %1426 = vrot.lane.b32.xlu0 %v3484_v62, %s3105_s8  ;;  %1428 = vrot.lane.b32.xlu1 %v3486_v0, %s3105_s8 }
 0x841   :  { %2061 = vmatpush2.bf16.msra.mxu0 %v2896_v25 }
 0x842   :  { %2062 = vmatprep.subr.bf16.mxu0 %v2904_v28 }
 0x845   :  { %2063 = vmatpush2.bf16.msra.mxu0 %v2902_v37 }
 0x846   :  { %2064 = vmatprep.subr.bf16.mxu0 %v2910_v44 }
 0x849   :  { %2065 = vmatpush2.bf16.msra.mxu0 %v2908_v40 }
 0x84a   :  { %2066 = vmatprep.subr.bf16.mxu0 %v2916_v38 }
 0x84d   :  { %2067 = vmatpush2.bf16.msra.mxu0 %v2914_v22 }
 0x84e   :  { %2068 = vmatprep.subr.bf16.mxu0 %v2922_v41 }
 0x851   :  { %2069 = vmatpush2.bf16.msra.mxu0 %v2920_v43 }
 0x8b2   :  { %v1427_v48 = vpop.permute.xlu0 %1426  ;;  %v1429_v50 = vpop.permute.xlu1 %1428 }
 0x8b3   :  { %v1430_v53 = vsel %vm294_vm2, %v1427_v48, %v1429_v50  ;;  %v1431_v51 = vsel %vm294_vm2, %v1429_v50, %v1427_v48  ;;  %v2905_v50 = vld [vmem:[#allocation11 + $0x260] ss:$8 sps:$4 sm:$0xff]  }
 0x8b4   :  { %v1432_v54 = vadd.f32 %v1431_v51, %v3484_v62  ;;  %v1433_v55 = vadd.f32 %v1430_v53, %v3486_v0  ;;  %v2913_v53 = vld [vmem:[#allocation11 + $0x254] ss:$8 sps:$4 sm:$0xff]  }
 0x8b6   :  { %v1434_v46 = vadd.f32 %v1433_v55, %v1432_v54 }
 0x8b8   :  { %v1435_v47 = vmul.f32 0.001953125, %v1434_v46 }
 0x8ba   :  { %v1436_v57 = vadd.f32 1e-05, %v1435_v47 }
 0x8bc   :  { %2965 = vrsqrt.f32 %v1436_v57 }
 0x8c9   :  { %v2966_v58 = vpop.eup %2965 }
 0x8ca   :  { %v1439_v59 = vcombine.low %v2966_v58, %v2966_v58 }
 0x8cc   :  { %v1446_v60 = vrot.slane %v1439_v59, %v3357_v52 }
 0x8ce   :  { %v1453_v1 = vrot.slane %v1446_v60, %v3357_v52  ;;  %v1562_v60 = vld [vmem:[#allocation2 + $0x20] sm:$0xff] }
 0x8d0   :  { %v1455_v62 = vmul.f32 %v1453_v1, %v1326_v61  ;;  %v1566_v61 = vld [vmem:[#allocation2 + $0x18] sm:$0x11] }
 0x8d2   :  { %v1460_v0 = vrot.slane %v1455_v62, %v3266_v19  ;;  %v1464_v12 = vrot.slane %v1455_v62, %v3365_v56 }
 0x8d4   :  { %v1467_v4 = vmul.f32 %v1460_v0, %v3445_v35  ;;  %v1468_v5 = vmul.f32 %v1464_v12, %v3439_v30  ;;  %v1469_v6 = vmul.f32 %v1460_v0, %v3448_v33  ;;  %v1470_v52 = vmul.f32 %v1464_v12, %v3441_v31 }
 0x8d5   :  { %v1472_v7 = vmul.f32 %v1464_v12, %v3443_v36  ;;  %v1474_v8 = vmul.f32 %v1464_v12, %v3452_v32  ;;  %v1471_v9 = vmul.f32 %v1460_v0, %v3450_v42  ;;  %v1473_v11 = vmul.f32 %v1460_v0, %v3458_v45  ;;  %v2899_v45 = vld [vmem:[#allocation11 + $0x270] ss:$8 sps:$4 sm:$0xff]  }
 0x8d6   :  { %v1486_v13 = vadd.f32 %v1479_v2, %v1467_v4  ;;  %v1487_v19 = vadd.f32 %v1483_v3, %v1468_v5  ;;  %v1488_v26 = vadd.f32 %v1479_v2, %v1469_v6  ;;  %v1489_v56 = vadd.f32 %v1483_v3, %v1470_v52  ;;  %v2911_v4 = vld [vmem:[#allocation11 + $0x250] ss:$8 sps:$4 sm:$0xff]   ;;  %v1569_v6 = vld [vmem:[#allocation2 + $0x10] sm:$0xff] }
 0x8d7   :  { %v1491_v14 = vadd.f32 %v1483_v3, %v1472_v7  ;;  %v1493_v35 = vadd.f32 %v1483_v3, %v1474_v8  ;;  %v1490_v23 = vadd.f32 %v1479_v2, %v1471_v9  ;;  %v1492_v30 = vadd.f32 %v1479_v2, %v1473_v11  ;;  %v1573_v52 = vld [vmem:[#allocation2] sm:$0x11]  ;;  %v2919_v11 = vld [vmem:[#allocation11 + $0x244] ss:$8 sps:$4 sm:$0xff]  }
 0x8d8   :  { %v1494_v15 = vmax.f32 %v1486_v13, 0.0  ;;  %v1495_v33 = vmax.f32 %v1487_v19, 0.0  ;;  %v1496_v27 = vmax.f32 %v1488_v26, 0.0  ;;  %v1497_v31 = vmax.f32 %v1489_v56, 0.0  ;;  %v2917_v26 = vld [vmem:[#allocation11 + $0x240] ss:$8 sps:$4 sm:$0xff]  }
 0x8d9   :  { %v1499_v16 = vmax.f32 %v1491_v14, 0.0  ;;  %v1501_v36 = vmax.f32 %v1493_v35, 0.0  ;;  %v1498_v24 = vmax.f32 %v1490_v23, 0.0  ;;  %v1500_v32 = vmax.f32 %v1492_v30, 0.0  ;;  %v2928_v23 = vld [vmem:[#allocation11 + $0x224] ss:$8 sps:$4 sm:$0xff]  }
 0x8da   :  { %v1503_v25 = vpack.c.bf16 %v1497_v31, %v1495_v33  ;;  %v2654_v42 = vpack.c.bf16 %v1495_v33, %v1494_v15  ;;  %v2655_v18 = vpack.c.bf16 %v1497_v31, %v1496_v27  ;;  %v1502_v29 = vpack.c.bf16 %v1496_v27, %v1494_v15 }
 0x8db   :  { %v2656_v28 = vpack.c.bf16 %v1499_v16, %v1498_v24  ;;  %v2657_v21 = vpack.c.bf16 %v1501_v36, %v1500_v32  ;;  %v1505_v34 = vpack.c.bf16 %v1501_v36, %v1499_v16  ;;  %v1504_v5 = vpack.c.bf16 %v1500_v32, %v1498_v24  ;;  %v2926_v36 = vld [vmem:[#allocation11 + $0x220] ss:$8 sps:$4 sm:$0xff]   ;;  %v2931_v32 = vld [vmem:[#allocation11 + $0x214] ss:$8 sps:$4 sm:$0xff]  }
 0x8dc   :  { %v1523_v37 = vshrl.u32 %v2654_v42, 16  ;;  %v1531_v44 = vshrl.u32 %v2655_v18, 16  ;;  %1837 = vmatprep.mubr.bf16.mxu1 %v1503_v25  ;;  %v1526_v41 = vshll.u32 %v2654_v42, 16  ;;  %v1534_v48 = vshll.u32 %v2655_v18, 16  ;;  %v2929_v25 = vld [vmem:[#allocation11 + $0x210] ss:$8 sps:$4 sm:$0xff]  }
 0x8dd   :  { %1838 = vmatmul.mubr.bf16.vlgmr.msra.gmra.mxu1 %v1502_v29  ;;  %v1540_v40 = vshrl.u32 %v2656_v28, 16  ;;  %v1548_v38 = vshrl.u32 %v2657_v21, 16  ;;  %v1543_v54 = vshll.u32 %v2656_v28, 16  ;;  %v1551_v46 = vshll.u32 %v2657_v21, 16  ;;  %v2934_v42 = vld [vmem:[#allocation11 + $0x204] ss:$8 sps:$4 sm:$0xff]  }
 0x8de   :  { %v1525_v22 = vrot.slane %v1523_v37, 7  ;;  %v1533_v43 = vrot.slane %v1531_v44, 7  ;;  %2327 = vmatpush1.bf16.msra.mxu1 %v2899_v45  ;;  %1847 = vmatprep.mubr.bf16.mxu1 %v1505_v34  ;;  %v2932_v18 = vld [vmem:[#allocation11 + $0x200] ss:$8 sps:$4 sm:$0xff]   ;;  %v2937_v45 = vld [vmem:[#allocation11 + $0x2f4] ss:$8 sps:$4 sm:$0xff]  }
 0x8df   :  { %2328 = vmatprep.subr.bf16.mxu1 %v2907_v20  ;;  %v1542_v51 = vrot.slane %v1540_v40, 7  ;;  %v1550_v55 = vrot.slane %v1548_v38, 7  ;;  %v2935_v29 = vld [vmem:[#allocation11 + $0x2f0] ss:$8 sps:$4 sm:$0xff]   ;;  %v2940_v20 = vld [vmem:[#allocation11 + $0x2e4] ss:$8 sps:$4 sm:$0xff]  }
 0x8e0   :  { %v1528_v47 = vor.u32 %v1526_v41, %v1525_v22  ;;  %v1529_v57 = vrot.slane %v1525_v22, 4  ;;  %v1536_v58 = vor.u32 %v1534_v48, %v1533_v43  ;;  %v1538_v59 = vrot.slane %v1533_v43, 4  ;;  %v2938_v28 = vld [vmem:[#allocation11 + $0x2e0] ss:$8 sps:$4 sm:$0xff]   ;;  %v2943_v21 = vld [vmem:[#allocation11 + $0x2d4] ss:$8 sps:$4 sm:$0xff]  }
 0x8e1   :  { %v1545_v1 = vor.u32 %v1543_v54, %v1542_v51  ;;  %v1546_v63 = vrot.slane %v1542_v51, 4  ;;  %v1553_v62 = vor.u32 %v1551_v46, %v1550_v55  ;;  %v1555_v0 = vrot.slane %v1550_v55, 4  ;;  %v2941_v37 = vld [vmem:[#allocation11 + $0x2d0] ss:$8 sps:$4 sm:$0xff]   ;;  %v2946_v44 = vld [vmem:[#allocation11 + $0x2c4] ss:$8 sps:$4 sm:$0xff]  }
 0x8e2   :  { %v1537_v12 = vsel %vm3384_vm9, %v1529_v57, %v1536_v58  ;;  %v1563_v2 = vsel %vm3346_vm7, %v1528_v47, %v1562_v60  ;;  %v1567_v3 = vsel %vm3332_vm11, %v1538_v59, %v1566_v61  ;;  %2329 = vmatpush1.bf16.msra.mxu1 %v2905_v50  ;;  %v2944_v34 = vld [vmem:[#allocation11 + $0x2c0] ss:$8 sps:$4 sm:$0xff]   ;;  %v2949_v40 = vld [vmem:[#allocation11 + $0x2b4] ss:$8 sps:$4 sm:$0xff]   ;;  %v2947_v38 = vld [vmem:[#allocation11 + $0x2b0] ss:$8 sps:$4 sm:$0xff]  }
 0x8e3   :  { %1564 = vst [vmem:[#allocation2 + $0x20] sm:$0xff] %v1563_v2  ;;  %1568 = vst [vmem:[#allocation2 + $0x18] sm:$0x11] %v1567_v3  ;;  %2330 = vmatprep.subr.bf16.mxu1 %v2913_v53  ;;  %v3526_v7 = vsel %vm3384_vm9, %v1546_v63, %v1553_v62  ;;  %v1570_v8 = vsel %vm3346_vm7, %v1545_v1, %v1569_v6  ;;  %v1574_v9 = vsel %vm3332_vm11, %v1555_v0, %v1573_v52  ;;  %v2952_v22 = vld [vmem:[#allocation11 + $0x2a4] ss:$8 sps:$4 sm:$0xff]  }
 0x8e4   :  { %v2576_v13 = vcombine.low %v1563_v2, %v1537_v12  ;;  %1571 = vst [vmem:[#allocation2 + $0x10] sm:$0xff] %v1570_v8  ;;  %1575 = vst [vmem:[#allocation2] sm:$0x11] %v1574_v9  ;;  %v2577_v19 = vcombine.high %v1563_v2, %v1537_v12  ;;  %v2579_v56 = vcombine.high %v1570_v8, %v3526_v7  ;;  %v2105_v14 = vrot.slane %v1537_v12, 5  ;;  %v2950_v41 = vld [vmem:[#allocation11 + $0x2a0] ss:$8 sps:$4 sm:$0xff]  }
 0x8e5   :  { %1848 = vmatmul.mubr.bf16.gmra.mxu1 %v1504_v5  ;;  %v2578_v16 = vcombine.low %v1570_v8, %v3526_v7  ;;  %v2955_v43 = vld [vmem:[#allocation11 + $0x294] ss:$8 sps:$4 sm:$0xff]   ;;  %v2953_v48 = vld [vmem:[#allocation11 + $0x290] ss:$8 sps:$4 sm:$0xff]   ;;  %v2958_v51 = vld [vmem:[#allocation11 + $0x284] ss:$8 sps:$4 sm:$0xff]  }
 0x8e6   :  { %2331 = vmatpush1.bf16.msra.mxu1 %v2911_v4  ;;  %2070 = vmatprep.mubr.bf16.mxu0 %v2577_v19  ;;  %v2107_v15 = vrot.slane %v2105_v14, 4  ;;  %v2112_v54 = vrot.slane %v3526_v7, 5  ;;  %v2956_v47 = vld [vmem:[#allocation11 + $0x280] ss:$8 sps:$4 sm:$0xff]  }
 0x8e7   :  { %2332 = vmatprep.subr.bf16.mxu1 %v2919_v11  ;;  %2071 = vmatmul.mubr.bf16.vlgmr.msra.gmra.mxu0 %v2576_v13 }
 0x8e8   :  { %2080 = vmatprep.mubr.bf16.mxu0 %v2579_v56  ;;  %v2114_v57 = vrot.slane %v2112_v54, 4  ;;  %v2387_v56 = vld [vmem:[#allocation12] sm:$0xff] }
 0x8ea   :  { %2333 = vmatpush1.bf16.msra.mxu1 %v2917_v26  ;;  %v2091_v10 = vld [vmem:[#allocation2 + $0x20] sm:$0xee]  ;;  %v2093_v35 = vld [vmem:[#allocation2 + $0x18] sm:$0x11] }
 0x8eb   :  { %2334 = vmatprep.subr.bf16.mxu1 %v2925_v49  ;;  %v2612_v30 = vrot.slane %v2091_v10, 9  ;;  %v2108_v33 = vrot.slane %v2093_v35, 5  ;;  %v2094_v50 = vld [vmem:[#allocation2 + $0x10] sm:$0xee]  ;;  %v2096_v53 = vld [vmem:[#allocation2] sm:$0x11] }
 0x8ec   :  { %v2613_v55 = vrot.slane %v2094_v50, 9  ;;  %v2115_v46 = vrot.slane %v2096_v53, 5  ;;  %v2388_v35 = vld [vmem:[#allocation12 + $0x8] sm:$0xff] }
 0x8ed   :  { %v2106_v27 = vsel %vm3403_vm12, %v2612_v30, %v2105_v14  ;;  %v2109_v31 = vsel %vm3403_vm12, %v2107_v15, %v2108_v33 }
 0x8ee   :  { %2335 = vmatpush1.bf16.msra.mxu1 %v2923_v39  ;;  %v2615_v24 = vcombine.high %v2106_v27, %v2109_v31  ;;  %v2113_v58 = vsel %vm3403_vm12, %v2613_v55, %v2112_v54  ;;  %v2116_v59 = vsel %vm3403_vm12, %v2114_v57, %v2115_v46  ;;  %v2614_v60 = vcombine.low %v2106_v27, %v2109_v31  ;;  %v2389_v31 = vld [vmem:[#allocation12 + $0x10] sm:$0xff]  ;;  %v2394_v54 = vld [vmem:[#allocation12 + $0x38] sm:$0xff] }
 0x8ef   :  { %2336 = vmatprep.subr.bf16.mxu1 %v2928_v23  ;;  %2081 = vmatmul.mubr.bf16.gmra.mxu0 %v2578_v16  ;;  %v2617_v61 = vcombine.high %v2113_v58, %v2116_v59  ;;  %v2616_v1 = vcombine.low %v2113_v58, %v2116_v59 }
 0x8f0   :  { %2358 = vmatprep.mubr.bf16.mxu1 %v2615_v24 }
 0x8f2   :  { %2337 = vmatpush1.bf16.msra.mxu1 %v2926_v36 }
 0x8f3   :  { %2338 = vmatprep.subr.bf16.mxu1 %v2931_v32 }
 0x8f6   :  { %2339 = vmatpush1.bf16.msra.mxu1 %v2929_v25  ;;  %v2390_v25 = vld [vmem:[#allocation12 + $0x18] sm:$0xff] }
 0x8f7   :  { %2340 = vmatprep.subr.bf16.mxu1 %v2934_v42 }
 0x8fa   :  { %2341 = vmatpush1.bf16.msra.mxu1 %v2932_v18 }
 0x8fb   :  { %2342 = vmatprep.subr.bf16.mxu1 %v2937_v45 }
 0x8fe   :  { %2343 = vmatpush2.bf16.msra.mxu1 %v2935_v29 }
 0x8ff   :  { %2344 = vmatprep.subr.bf16.mxu1 %v2940_v20 }
 0x902   :  { %2345 = vmatpush2.bf16.msra.mxu1 %v2938_v28  ;;  %v2391_v28 = vld [vmem:[#allocation12 + $0x20] sm:$0xff] }
 0x903   :  { %2346 = vmatprep.subr.bf16.mxu1 %v2943_v21 }
 0x906   :  { %2347 = vmatpush2.bf16.msra.mxu1 %v2941_v37 }
 0x907   :  { %2348 = vmatprep.subr.bf16.mxu1 %v2946_v44 }
 0x90a   :  { %2349 = vmatpush2.bf16.msra.mxu1 %v2944_v34 }
 0x90b   :  { %2350 = vmatprep.subr.bf16.mxu1 %v2949_v40  ;;  %v2392_v40 = vld [vmem:[#allocation12 + $0x28] sm:$0xff] }
 0x90e   :  { %2351 = vmatpush2.bf16.msra.mxu1 %v2947_v38 }
 0x90f   :  { %2352 = vmatprep.subr.bf16.mxu1 %v2952_v22 }
 0x912   :  { %2353 = vmatpush2.bf16.msra.mxu1 %v2950_v41 }
 0x913   :  { %2354 = vmatprep.subr.bf16.mxu1 %v2955_v43 }
 0x916   :  { %2355 = vmatpush2.bf16.msra.mxu1 %v2953_v48  ;;  %v2393_v48 = vld [vmem:[#allocation12 + $0x30] sm:$0xff] }
 0x917   :  { %2356 = vmatprep.subr.bf16.mxu1 %v2958_v51 }
 0x91a   :  { %2357 = vmatpush2.bf16.msra.mxu1 %v2956_v47 }
 0x91d   :  { %2359 = vmatmul.mubr.bf16.vlgmr.msra.gmra.mxu1 %v2614_v60 }
 0x91e   :  { %2368 = vmatprep.mubr.bf16.mxu1 %v2617_v61 }
 0x925   :  { %2369 = vmatmul.mubr.bf16.gmra.mxu1 %v2616_v1 }
 0x99d   :  { %v1839_v63 = vpop.f32.mrf.mxu1 }
 0x99f   :  { %v1841_v62 = vpop.f32.mrf.mxu1 }
 0x9a1   :  { %v1843_v0 = vpop.f32.mrf.mxu1 }
 0x9a3   :  { %v1845_v12 = vpop.f32.mrf.mxu1 }
 0x9a5   :  { %v1849_v3 = vpop.f32.mrf.mxu1 }
 0x9a7   :  { %v2072_v2 = vpop.f32.mrf.mxu0  ;;  %v1851_v5 = vpop.f32.mrf.mxu1 }
 0x9a8   :  { %v2073_v9 = vadd.f32 %v2072_v2, %v1839_v63 }
 0x9a9   :  { %v2074_v4 = vpop.f32.mrf.mxu0  ;;  %v1853_v52 = vpop.f32.mrf.mxu1 }
 0x9aa   :  { %v2075_v13 = vadd.f32 %v2074_v4, %v1841_v62 }
 0x9ab   :  { %v2076_v6 = vpop.f32.mrf.mxu0  ;;  %v1855_v17 = vpop.f32.mrf.mxu1 }
 0x9ac   :  { %v2077_v14 = vadd.f32 %v2076_v6, %v1843_v0 }
 0x9ad   :  { %v2078_v7 = vpop.f32.mrf.mxu0 }
 0x9ae   :  { %v2079_v30 = vadd.f32 %v2078_v7, %v1845_v12 }
 0x9af   :  { %v2082_v8 = vpop.f32.mrf.mxu0 }
 0x9b0   :  { %v2083_v36 = vadd.f32 %v2082_v8, %v1849_v3 }
 0x9b1   :  { %v2084_v26 = vpop.f32.mrf.mxu0 }
 0x9b2   :  { %v2085_v18 = vadd.f32 %v2084_v26, %v1851_v5 }
 0x9b3   :  { %v2086_v27 = vpop.f32.mrf.mxu0 }
 0x9b4   :  { %v2087_v37 = vadd.f32 %v2086_v27, %v1853_v52 }
 0x9b5   :  { %v2088_v20 = vpop.f32.mrf.mxu0 }
 0x9b6   :  { %v2089_v22 = vadd.f32 %v2088_v20, %v1855_v17 }
 0x9dd   :  { %v2360_v11 = vpop.f32.mrf.mxu1 }
 0x9de   :  { %v2379_v19 = vadd.f32 %v2360_v11, %v2073_v9 }
 0x9df   :  { %v2362_v49 = vpop.f32.mrf.mxu1 }
 0x9e0   :  { %v2395_v39 = vadd.f32 %v2387_v56, %v2379_v19  ;;  %v2380_v10 = vadd.f32 %v2362_v49, %v2075_v13 }
 0x9e1   :  { %v2364_v23 = vpop.f32.mrf.mxu1 }
 0x9e2   :  { %2403 = vst [vmem:[#allocation12] sm:$0xff] %v2395_v39  ;;  %v2396_v15 = vadd.f32 %v2388_v35, %v2380_v10  ;;  %v2381_v33 = vadd.f32 %v2364_v23, %v2077_v14 }
 0x9e3   :  { %v2366_v16 = vpop.f32.mrf.mxu1 }
 0x9e4   :  { %2404 = vst [vmem:[#allocation12 + $0x8] sm:$0xff] %v2396_v15  ;;  %v2397_v24 = vadd.f32 %v2389_v31, %v2381_v33  ;;  %v2382_v32 = vadd.f32 %v2366_v16, %v2079_v30 }
 0x9e5   :  { %v2370_v42 = vpop.f32.mrf.mxu1 }
 0x9e6   :  { %2405 = vst [vmem:[#allocation12 + $0x10] sm:$0xff] %v2397_v24  ;;  %v2398_v45 = vadd.f32 %v2390_v25, %v2382_v32  ;;  %v2383_v29 = vadd.f32 %v2370_v42, %v2083_v36 }
 0x9e7   :  { %v2372_v21 = vpop.f32.mrf.mxu1 }
 0x9e8   :  { %2406 = vst [vmem:[#allocation12 + $0x18] sm:$0xff] %v2398_v45  ;;  %v2399_v44 = vadd.f32 %v2391_v28, %v2383_v29  ;;  %v2384_v34 = vadd.f32 %v2372_v21, %v2085_v18 }
 0x9e9   :  { %v2374_v38 = vpop.f32.mrf.mxu1 }
 0x9ea   :  { %2407 = vst [vmem:[#allocation12 + $0x20] sm:$0xff] %v2399_v44  ;;  %v2400_v41 = vadd.f32 %v2392_v40, %v2384_v34  ;;  %v2385_v43 = vadd.f32 %v2374_v38, %v2087_v37 }
 0x9eb   :  { %v2376_v50 = vpop.f32.mrf.mxu1 }
 0x9ec   :  { %2408 = vst [vmem:[#allocation12 + $0x28] sm:$0xff] %v2400_v41  ;;  %v2401_v53 = vadd.f32 %v2393_v48, %v2385_v43  ;;  %v2386_v51 = vadd.f32 %v2376_v50, %v2089_v22 }
 0x9ee   :  { %2409 = vst [vmem:[#allocation12 + $0x30] sm:$0xff] %v2401_v53  ;;  %v2402_v55 = vadd.f32 %v2394_v54, %v2386_v51 }
 0x9f0   :  { %2410 = vst [vmem:[#allocation12 + $0x38] sm:$0xff] %v2402_v55 }
 0x9f1   :  { %3078 = shalt.err (!%p3075_p1)
}
 0x9f2   :  { %2422 = dma.vmem_to_hbm [thread:$0]  %s2417_s7, 1024, %s3558_s9, [#allocation5], %s3097_s14, %s3097_s14, %s3098_s15  }
 0x9f3   :  { %3093 = dma.done.wait [#allocation5], 1024  }
 0x9f4   :  { %3094 = vsyncadd [#allocation5], 4294966272 }
 0x9f5   :  { %2426 = vsyncpa [#allocation4], 1 }
 0x9f6   :  { %2427 = vsyncpa [#allocation7], 1 }
 0x9f7   :  { %2428 = vsyncpa [#allocation10], 1 }
 0x9f8   :  { %2429 = vsyncpa [#allocation5], 1 }

</bundles_post_ra>
